<compile_context>
chip_gen: v7x
topology: tpu7x:2x2x1
jax: 0.10.0
libtpu: 0.0.40
codegen_flags: <defaults>
</compile_context>

<pallas_src>
import functools

import jax
import jax.numpy as jnp
from jax.experimental import pallas as pl
from jax.experimental.pallas import tpu as pltpu

# ---------------- model dims (small, consistent with the forward pass) -------
B = 2            # batch
B_PAD = 8        # sublane-padded batch (one full vreg row block)
C_IN = 3         # RGB input channels (ResNet expects 3)
H = W = 16       # spatial
KH = KW = 3      # conv kernel
K = C_IN * KH * KW           # im2col contraction dim = 27
K_PAD = 32                   # zero-padded contraction dim (lane friendlier)
C_MID = 128      # conv output channels (lane-aligned)
FEAT = 2048      # backbone feature dim (matches nn.Linear(2048, 8) heads)
N_HEADS = 10
HEAD_OUT = 8
OUT_PAD = 128                # lane-padded packed-head output (>= N_HEADS*HEAD_OUT)


# ----------------------- fused backbone + ROI heads kernel -------------------
def fused_cv_kernel(patch_ref, wc_ref, bc_ref, pool_ref,
                    wp_ref, bp_ref, wh_ref, bh_ref, out_ref):
    # patch_ref: (B*H*W, K_PAD) f32      wc_ref:   (K_PAD, C_MID) f32
    # bc_ref:    (1, C_MID) f32          pool_ref: (B_PAD, B*H*W) f32 (1/(H*W) blkdiag)
    # wp_ref:    (C_MID, FEAT) bf16      bp_ref:   (1, FEAT) f32
    # wh_ref:    (FEAT, OUT_PAD) bf16    bh_ref:   (1, OUT_PAD) f32
    # out_ref:   (B_PAD, OUT_PAD) f32

    # Stage 1: 3x3 conv as im2col matmul + bias + ReLU over all B*H*W rows.
    y = jnp.dot(patch_ref[...], wc_ref[...],
                preferred_element_type=jnp.float32)              # (B*H*W, C_MID)
    y = jnp.maximum(y + bc_ref[...], 0.0)

    # Stage 2: per-batch global average pool as a block-diagonal matmul (MXU);
    # 1/(H*W) scale is already folded into pool_ref.  Rows >= B are zero.
    pooled = jnp.dot(pool_ref[...], y,
                     preferred_element_type=jnp.float32)         # (B_PAD, C_MID)

    # Stage 3: projection to 2048-dim backbone features + ReLU
    # (bf16 weights, f32 accumulate, f32 elementwise).
    h = jnp.dot(pooled.astype(jnp.bfloat16), wp_ref[...],
                preferred_element_type=jnp.float32)              # (B_PAD, FEAT)
    h = jnp.maximum(h + bp_ref[...], 0.0)

    # Stage 4: all 10 ROI heads as one lane-padded (FEAT, 128) matmul + bias.
    o = jnp.dot(h.astype(jnp.bfloat16), wh_ref[...],
                preferred_element_type=jnp.float32)              # (B_PAD, OUT_PAD)
    out_ref[...] = o + bh_ref[...]                               # single unmasked vst


def fused_forward_call(patches, pool, params):
    vmem = pl.BlockSpec(memory_space=pltpu.MemorySpace.VMEM)
    return pl.pallas_call(
        fused_cv_kernel,
        out_shape=jax.ShapeDtypeStruct((B_PAD, OUT_PAD), jnp.float32),
        in_specs=[vmem] * 8,
        out_specs=vmem,
        compiler_params=pltpu.CompilerParams(
            # ~1.3 MiB of operands; generous explicit headroom, well under the
            # scoped default on v5e/v6e/v7x.
            vmem_limit_bytes=16 * 1024 * 1024),
    )(patches, params["w_conv"], params["b_conv"], pool,
      params["w_proj"], params["b_proj"], params["w_heads"], params["b_heads"])


# ------------------------------ glue (plain JAX) ------------------------------
def im2col(x):
    # x: (B, C_IN, H, W) NCHW -> (B*H*W, K_PAD), 3x3 conv, padding=1, stride=1,
    # last dim zero-padded from K=27 to K_PAD=32.
    xp = jnp.pad(x, ((0, 0), (0, 0), (1, 1), (1, 1)))
    cols = []
    for c in range(C_IN):
        for i in range(KH):
            for j in range(KW):
                cols.append(xp[:, c, i:i + H, j:j + W].reshape(B, H * W))
    patches = jnp.stack(cols, axis=-1)                 # (B, H*W, K)
    patches = patches.reshape(B * H * W, K)
    return jnp.pad(patches, ((0, 0), (0, K_PAD - K)))  # (B*H*W, K_PAD)


def make_pool_matrix():
    # Block-diagonal per-batch average pooling matrix, scale folded in,
    # sublane-padded to B_PAD rows (rows >= B are zero).
    pool = jnp.repeat(jnp.eye(B, dtype=jnp.float32), H * W, axis=1) / float(H * W)
    return jnp.pad(pool, ((0, B_PAD - B), (0, 0)))     # (B_PAD, B*H*W)


def init_params(key):
    ks = jax.random.split(key, 6)
    p = {}
    # Conv weight rows beyond K are multiplied by zero-padded patch columns.
    p["w_conv"] = jax.random.normal(ks[0], (K_PAD, C_MID), jnp.float32) * 0.05
    p["b_conv"] = jax.random.normal(ks[1], (1, C_MID), jnp.float32) * 0.01
    # Big weight matrices stored in bf16 (halves HBM traffic; MXU accumulates f32).
    p["w_proj"] = (jax.random.normal(ks[2], (C_MID, FEAT), jnp.float32)
                   * 0.05).astype(jnp.bfloat16)
    p["b_proj"] = jax.random.normal(ks[3], (1, FEAT), jnp.float32) * 0.01
    # 10 independent nn.Linear(2048, 8) heads packed as (FEAT, 80), lane-padded
    # with zeros to (FEAT, 128); host slices the first 80 output lanes.
    w_heads = jax.random.normal(
        ks[4], (FEAT, N_HEADS * HEAD_OUT), jnp.float32) * 0.02
    p["w_heads"] = jnp.pad(
        w_heads, ((0, 0), (0, OUT_PAD - N_HEADS * HEAD_OUT))).astype(jnp.bfloat16)
    b_heads = jax.random.normal(
        ks[5], (1, N_HEADS * HEAD_OUT), jnp.float32) * 0.01
    p["b_heads"] = jnp.pad(b_heads, ((0, 0), (0, OUT_PAD - N_HEADS * HEAD_OUT)))
    return p


@functools.partial(jax.jit, static_argnames=())
def forward(params, images, targets=None):
    # `targets` is accepted and ignored, matching the PyTorch module.
    del targets
    patches = im2col(images)                            # (B*H*W, K_PAD)
    pool = make_pool_matrix()                           # (B_PAD, B*H*W)
    out = fused_forward_call(patches, pool, params)     # (B_PAD, 128) padded
    all_heads = out[:B, :N_HEADS * HEAD_OUT].reshape(B, N_HEADS, HEAD_OUT)
    return [all_heads[:, i, :] for i in range(N_HEADS)]  # list of 10 (B, 8)


if __name__ == "__main__":
    key = jax.random.PRNGKey(0)
    k_img, k_par = jax.random.split(key)
    images = jax.random.normal(k_img, (B, C_IN, H, W), jnp.float32)
    params = init_params(k_par)

    roi_features = forward(params, images, targets=None)
    roi_features = [jax.block_until_ready(r) for r in roi_features]

    assert len(roi_features) == N_HEADS
    assert all(r.shape == (B, HEAD_OUT) for r in roi_features)
    assert all(jnp.all(jnp.isfinite(r)) for r in roi_features)
    print("KERNEL_OK")
</pallas_src>

<mosaic_0001>
module attributes {stable_mosaic.version = 11 : i64} {
  func.func @fused_cv_kernel(%arg0: memref<512x32xf32, #tpu.memory_space<vmem>>, %arg1: memref<32x128xf32, #tpu.memory_space<vmem>>, %arg2: memref<1x128xf32, #tpu.memory_space<vmem>>, %arg3: memref<8x512xf32, #tpu.memory_space<vmem>>, %arg4: memref<128x2048xbf16, #tpu.memory_space<vmem>>, %arg5: memref<1x2048xf32, #tpu.memory_space<vmem>>, %arg6: memref<2048x128xbf16, #tpu.memory_space<vmem>>, %arg7: memref<1x128xf32, #tpu.memory_space<vmem>>, %arg8: memref<8x128xf32, #tpu.memory_space<vmem>>) attributes {dimension_semantics = [], scalar_prefetch = 0 : i64, scratch_operands = 0 : i64, tpu.core_type = #tpu.core_type<tc>} {
    %c0 = arith.constant 0 : index
    %c0_0 = arith.constant 0 : index
    %0 = vector.load %arg0[%c0, %c0_0] : memref<512x32xf32, #tpu.memory_space<vmem>>, vector<512x32xf32>
    %c0_1 = arith.constant 0 : index
    %c0_2 = arith.constant 0 : index
    %1 = vector.load %arg1[%c0_1, %c0_2] : memref<32x128xf32, #tpu.memory_space<vmem>>, vector<32x128xf32>
    %cst = arith.constant dense<0.000000e+00> : vector<512x128xf32>
    %2 = tpu.matmul %0, %1, %cst {dimension_numbers = #tpu.dot_dimension_numbers<[1], [0], [0], [1], [0, 0, 1, 1], [], []>} : vector<512x32xf32>, vector<32x128xf32>, vector<512x128xf32> -> vector<512x128xf32>
    %c0_3 = arith.constant 0 : index
    %c0_4 = arith.constant 0 : index
    %3 = vector.load %arg2[%c0_3, %c0_4] : memref<1x128xf32, #tpu.memory_space<vmem>>, vector<1x128xf32>
    %4 = vector.broadcast %3 : vector<1x128xf32> to vector<512x128xf32>
    %5 = arith.addf %2, %4 : vector<512x128xf32>
    %cst_5 = arith.constant 0.000000e+00 : f32
    %6 = vector.broadcast %cst_5 : f32 to vector<512x128xf32>
    %7 = arith.maximumf %5, %6 : vector<512x128xf32>
    %c0_6 = arith.constant 0 : index
    %c0_7 = arith.constant 0 : index
    %8 = vector.load %arg3[%c0_6, %c0_7] : memref<8x512xf32, #tpu.memory_space<vmem>>, vector<8x512xf32>
    %cst_8 = arith.constant dense<0.000000e+00> : vector<8x128xf32>
    %9 = tpu.matmul %8, %7, %cst_8 {dimension_numbers = #tpu.dot_dimension_numbers<[1], [0], [0], [1], [0, 0, 1, 1], [], []>} : vector<8x512xf32>, vector<512x128xf32>, vector<8x128xf32> -> vector<8x128xf32>
    %10 = arith.truncf %9 : vector<8x128xf32> to vector<8x128xbf16>
    %c0_9 = arith.constant 0 : index
    %c0_10 = arith.constant 0 : index
    %11 = vector.load %arg4[%c0_9, %c0_10] : memref<128x2048xbf16, #tpu.memory_space<vmem>>, vector<128x2048xbf16>
    %cst_11 = arith.constant dense<0.000000e+00> : vector<8x2048xf32>
    %12 = tpu.matmul %10, %11, %cst_11 {dimension_numbers = #tpu.dot_dimension_numbers<[1], [0], [0], [1], [0, 0, 1, 1], [], []>} : vector<8x128xbf16>, vector<128x2048xbf16>, vector<8x2048xf32> -> vector<8x2048xf32>
    %c0_12 = arith.constant 0 : index
    %c0_13 = arith.constant 0 : index
    %13 = vector.load %arg5[%c0_12, %c0_13] : memref<1x2048xf32, #tpu.memory_space<vmem>>, vector<1x2048xf32>
    %14 = vector.broadcast %13 : vector<1x2048xf32> to vector<8x2048xf32>
    %15 = arith.addf %12, %14 : vector<8x2048xf32>
    %cst_14 = arith.constant 0.000000e+00 : f32
    %16 = vector.broadcast %cst_14 : f32 to vector<8x2048xf32>
    %17 = arith.maximumf %15, %16 : vector<8x2048xf32>
    %18 = arith.truncf %17 : vector<8x2048xf32> to vector<8x2048xbf16>
    %c0_15 = arith.constant 0 : index
    %c0_16 = arith.constant 0 : index
    %19 = vector.load %arg6[%c0_15, %c0_16] : memref<2048x128xbf16, #tpu.memory_space<vmem>>, vector<2048x128xbf16>
    %cst_17 = arith.constant dense<0.000000e+00> : vector<8x128xf32>
    %20 = tpu.matmul %18, %19, %cst_17 {dimension_numbers = #tpu.dot_dimension_numbers<[1], [0], [0], [1], [0, 0, 1, 1], [], []>} : vector<8x2048xbf16>, vector<2048x128xbf16>, vector<8x128xf32> -> vector<8x128xf32>
    %c0_18 = arith.constant 0 : index
    %c0_19 = arith.constant 0 : index
    %21 = vector.load %arg7[%c0_18, %c0_19] : memref<1x128xf32, #tpu.memory_space<vmem>>, vector<1x128xf32>
    %22 = vector.broadcast %21 : vector<1x128xf32> to vector<8x128xf32>
    %23 = arith.addf %20, %22 : vector<8x128xf32>
    %c0_20 = arith.constant 0 : index
    %c0_21 = arith.constant 0 : index
    %24 = vector.load %arg8[%c0_20, %c0_21] : memref<8x128xf32, #tpu.memory_space<vmem>>, vector<8x128xf32>
    tpu.vector_store %arg8[%c0_20, %c0_21], %23 {strides = array<i32>} : memref<8x128xf32, #tpu.memory_space<vmem>>, vector<8x128xf32>,
    return
  }
}

</mosaic_0001>

<bundles_post_ra>
// kernel: forward.1
= control target key start
LH: loop header
LB: loop body
LE: loop exit
PB: predicated region body
PF: predicated region fallthrough
CT: control target
= control target key end

     0   :  { %vm105_vm0 = vcmask 261120   ;;  %s5702_s1 = inlined_call_operand.vmem [shape: f32[32,128], index: 1, kind: input, shape index: {}]   ;;  %s5703_s0 = inlined_call_operand.vmem [shape: f32[512,32], index: 0, kind: input, shape index: {}]   ;;  %s5704_s3 = inlined_call_operand.vmem [shape: f32[8,512], index: 3, kind: input, shape index: {}]   ;;  %s5705_s2 = inlined_call_operand.vmem [shape: f32[1,128], index: 2, kind: input, shape index: {}]   ;;  %s5706_s4 = inlined_call_operand.vmem [shape: bf16[128,2048], index: 4, kind: input, shape index: {}]   ;;  %s5707_s6 = inlined_call_operand.vmem [shape: bf16[2048,128], index: 6, kind: input, shape index: {}]   ;;  %s5708_s5 = inlined_call_operand.vmem [shape: f32[1,2048], index: 5, kind: input, shape index: {}]   ;;  %s5709_s7 = inlined_call_operand.vmem [shape: f32[1,128], index: 7, kind: input, shape index: {}]   ;;  %s5710_s8 = inlined_call_operand.vmem [shape: f32[8,128], index: 8, kind: output, shape index: {}]  }
   0x1   :  { %v94_v0 = vld [vmem:[%s5702_s1] sm:$0xff]  ;;  %v95_v1 = vld [vmem:[%s5702_s1 + $0x8] sm:$0xff]  ;;  %v96_v2 = vld [vmem:[%s5702_s1 + $0x10] sm:$0xff] }
   0x2   :  { %v4200_v3 = vpack.c.bf16 %v95_v1, %v94_v0  ;;  %v97_v4 = vld [vmem:[%s5702_s1 + $0x18] sm:$0xff]  ;;  %v30_v5 = vld [vmem:[%s5703_s0] sm:$0xff]  ;;  %v31_v7 = vld [vmem:[%s5703_s0 + $0x8] sm:$0xff] }
   0x3   :  { %v4204_v6 = vpack.c.bf16 %v97_v4, %v96_v2  ;;  %4104 = vmatprep.mubr.msk.f32.mxu0 %vm105_vm0, %v30_v5  ;;  %v32_v8 = vld [vmem:[%s5703_s0 + $0x10] sm:$0xff]  ;;  %v33_v9 = vld [vmem:[%s5703_s0 + $0x18] sm:$0xff]  ;;  %v34_v10 = vld [vmem:[%s5703_s0 + $0x20] sm:$0xff] }
   0x4   :  { %4201 = vmatprep.subr.bf16.mxu0 %v4200_v3  ;;  %v35_v11 = vld [vmem:[%s5703_s0 + $0x28] sm:$0xff]  ;;  %v36_v12 = vld [vmem:[%s5703_s0 + $0x30] sm:$0xff]  ;;  %v37_v13 = vld [vmem:[%s5703_s0 + $0x38] sm:$0xff] }
   0x5   :  { %4203 = vmatpush3.bf16.msra.mxu0 %v4200_v3  ;;  %v38_v14 = vld [vmem:[%s5703_s0 + $0x40] sm:$0xff]  ;;  %v39_v15 = vld [vmem:[%s5703_s0 + $0x48] sm:$0xff]  ;;  %v40_v16 = vld [vmem:[%s5703_s0 + $0x50] sm:$0xff] }
   0x6   :  { %4205 = vmatprep.subr.bf16.mxu0 %v4204_v6  ;;  %v41_v17 = vld [vmem:[%s5703_s0 + $0x58] sm:$0xff]  ;;  %v42_v18 = vld [vmem:[%s5703_s0 + $0x60] sm:$0xff]  ;;  %v43_v19 = vld [vmem:[%s5703_s0 + $0x68] sm:$0xff] }
   0x7   :  { %v44_v20 = vld [vmem:[%s5703_s0 + $0x70] sm:$0xff]  ;;  %v45_v21 = vld [vmem:[%s5703_s0 + $0x78] sm:$0xff]  ;;  %v46_v22 = vld [vmem:[%s5703_s0 + $0x80] sm:$0xff] }
   0x8   :  { %v47_v23 = vld [vmem:[%s5703_s0 + $0x88] sm:$0xff]  ;;  %v48_v24 = vld [vmem:[%s5703_s0 + $0x90] sm:$0xff]  ;;  %v49_v25 = vld [vmem:[%s5703_s0 + $0x98] sm:$0xff] }
   0x9   :  { %4207 = vmatpush3.bf16.msra.mxu0 %v4204_v6  ;;  %v50_v26 = vld [vmem:[%s5703_s0 + $0xa0] sm:$0xff]  ;;  %v51_v27 = vld [vmem:[%s5703_s0 + $0xa8] sm:$0xff]  ;;  %v52_v28 = vld [vmem:[%s5703_s0 + $0xb0] sm:$0xff] }
   0xa   :  { %v53_v29 = vld [vmem:[%s5703_s0 + $0xb8] sm:$0xff]  ;;  %v54_v30 = vld [vmem:[%s5703_s0 + $0xc0] sm:$0xff]  ;;  %v55_v31 = vld [vmem:[%s5703_s0 + $0xc8] sm:$0xff] }
   0xb   :  { %v56_v32 = vld [vmem:[%s5703_s0 + $0xd0] sm:$0xff]  ;;  %v57_v33 = vld [vmem:[%s5703_s0 + $0xd8] sm:$0xff]  ;;  %v58_v34 = vld [vmem:[%s5703_s0 + $0xe0] sm:$0xff] }
   0xc   :  { %4105 = vmatmul.mubr.msk.f32.vlgmr.msra.gmra.mrb[0].mxu0 %vm105_vm0, %v31_v7  ;;  %v59_v35 = vld [vmem:[%s5703_s0 + $0xe8] sm:$0xff]  ;;  %v60_v36 = vld [vmem:[%s5703_s0 + $0xf0] sm:$0xff]  ;;  %v61_v37 = vld [vmem:[%s5703_s0 + $0xf8] sm:$0xff] }
   0xd   :  { %4107 = vmatprep.mubr.msk.f32.mxu0 %vm105_vm0, %v32_v8  ;;  %v62_v38 = vld [vmem:[%s5703_s0 + $0x100] sm:$0xff]  ;;  %v63_v39 = vld [vmem:[%s5703_s0 + $0x108] sm:$0xff]  ;;  %v64_v40 = vld [vmem:[%s5703_s0 + $0x110] sm:$0xff] }
   0xe   :  { %v65_v41 = vld [vmem:[%s5703_s0 + $0x118] sm:$0xff]  ;;  %v66_v42 = vld [vmem:[%s5703_s0 + $0x120] sm:$0xff]  ;;  %v67_v43 = vld [vmem:[%s5703_s0 + $0x128] sm:$0xff] }
   0xf   :  { %v68_v44 = vld [vmem:[%s5703_s0 + $0x130] sm:$0xff]  ;;  %v69_v45 = vld [vmem:[%s5703_s0 + $0x138] sm:$0xff]  ;;  %v70_v46 = vld [vmem:[%s5703_s0 + $0x140] sm:$0xff] }
  0x10   :  { %4108 = vmatmul.mubr.msk.f32.gmra.mrb[2].mxu0 %vm105_vm0, %v33_v9  ;;  %v71_v47 = vld [vmem:[%s5703_s0 + $0x148] sm:$0xff]  ;;  %v72_v48 = vld [vmem:[%s5703_s0 + $0x150] sm:$0xff]  ;;  %v73_v49 = vld [vmem:[%s5703_s0 + $0x158] sm:$0xff] }
  0x11   :  { %4110 = vmatprep.mubr.msk.f32.mxu0 %vm105_vm0, %v34_v10  ;;  %v74_v50 = vld [vmem:[%s5703_s0 + $0x160] sm:$0xff]  ;;  %v75_v51 = vld [vmem:[%s5703_s0 + $0x168] sm:$0xff]  ;;  %v76_v52 = vld [vmem:[%s5703_s0 + $0x170] sm:$0xff] }
  0x12   :  { %v77_v53 = vld [vmem:[%s5703_s0 + $0x178] sm:$0xff]  ;;  %v78_v54 = vld [vmem:[%s5703_s0 + $0x180] sm:$0xff]  ;;  %v79_v55 = vld [vmem:[%s5703_s0 + $0x188] sm:$0xff] }
  0x13   :  { %v80_v56 = vld [vmem:[%s5703_s0 + $0x190] sm:$0xff]  ;;  %v81_v57 = vld [vmem:[%s5703_s0 + $0x198] sm:$0xff]  ;;  %v82_v58 = vld [vmem:[%s5703_s0 + $0x1a0] sm:$0xff] }
  0x14   :  { %4111 = vmatmul.mubr.msk.f32.gmra.mrb[4].mxu0 %vm105_vm0, %v35_v11  ;;  %v83_v59 = vld [vmem:[%s5703_s0 + $0x1a8] sm:$0xff]  ;;  %v84_v60 = vld [vmem:[%s5703_s0 + $0x1b0] sm:$0xff]  ;;  %v85_v61 = vld [vmem:[%s5703_s0 + $0x1b8] sm:$0xff] }
  0x15   :  { %4113 = vmatprep.mubr.msk.f32.mxu0 %vm105_vm0, %v36_v12  ;;  %v86_v62 = vld [vmem:[%s5703_s0 + $0x1c0] sm:$0xff]  ;;  %v87_v63 = vld [vmem:[%s5703_s0 + $0x1c8] sm:$0xff]  ;;  %v88_v0 = vld [vmem:[%s5703_s0 + $0x1d0] sm:$0xff] }
  0x16   :  { %v89_v1 = vld [vmem:[%s5703_s0 + $0x1d8] sm:$0xff]  ;;  %v90_v2 = vld [vmem:[%s5703_s0 + $0x1e0] sm:$0xff]  ;;  %v91_v3 = vld [vmem:[%s5703_s0 + $0x1e8] sm:$0xff] }
  0x17   :  { %v92_v4 = vld [vmem:[%s5703_s0 + $0x1f0] sm:$0xff]  ;;  %v93_v5 = vld [vmem:[%s5703_s0 + $0x1f8] sm:$0xff]  ;;  %v748_v6 = vld [vmem:[%s5704_s3 + $0x8] sm:$0xff] }
  0x18   :  { %4114 = vmatmul.mubr.msk.f32.gmra.mrb[6].mxu0 %vm105_vm0, %v37_v13  ;;  %815 = vmatprep.mubr.f32.mxu1 %v748_v6  ;;  %v4721_v7 = vld [vmem:[%s5705_s2] ss:$0 sm:$0xff] }
  0x19   :  { %4116 = vmatprep.mubr.msk.f32.mxu0 %vm105_vm0, %v38_v14 }
  0x1c   :  { %4117 = vmatmul.mubr.msk.f32.gmra.mrb[8].mxu0 %vm105_vm0, %v39_v15 }
  0x1d   :  { %4119 = vmatprep.mubr.msk.f32.mxu0 %vm105_vm0, %v40_v16 }
  0x20   :  { %4120 = vmatmul.mubr.msk.f32.gmra.mrb[10].mxu0 %vm105_vm0, %v41_v17 }
  0x21   :  { %4122 = vmatprep.mubr.msk.f32.mxu0 %vm105_vm0, %v42_v18 }
  0x24   :  { %4123 = vmatmul.mubr.msk.f32.gmra.mrb[12].mxu0 %vm105_vm0, %v43_v19 }
  0x25   :  { %4125 = vmatprep.mubr.msk.f32.mxu0 %vm105_vm0, %v44_v20 }
  0x28   :  { %4126 = vmatmul.mubr.msk.f32.gmra.mrb[14].mxu0 %vm105_vm0, %v45_v21 }
  0x29   :  { %4128 = vmatprep.mubr.msk.f32.mxu0 %vm105_vm0, %v46_v22 }
  0x2c   :  { %4129 = vmatmul.mubr.msk.f32.gmra.mrb[16].mxu0 %vm105_vm0, %v47_v23 }
  0x2d   :  { %4131 = vmatprep.mubr.msk.f32.mxu0 %vm105_vm0, %v48_v24  ;;  %v894_v24 = vld [vmem:[%s5706_s4 + $0x10] sm:$0xff] }
  0x30   :  { %4132 = vmatmul.mubr.msk.f32.gmra.mrb[18].mxu0 %vm105_vm0, %v49_v25  ;;  %v902_v25 = vld [vmem:[%s5706_s4 + $0x50] sm:$0xff] }
  0x31   :  { %4134 = vmatprep.mubr.msk.f32.mxu0 %vm105_vm0, %v50_v26  ;;  %v910_v26 = vld [vmem:[%s5706_s4 + $0x90] sm:$0xff] }
  0x34   :  { %4135 = vmatmul.mubr.msk.f32.gmra.mrb[20].mxu0 %vm105_vm0, %v51_v27 }
  0x35   :  { %4137 = vmatprep.mubr.msk.f32.mxu0 %vm105_vm0, %v52_v28 }
  0x38   :  { %4138 = vmatmul.mubr.msk.f32.gmra.mrb[22].mxu0 %vm105_vm0, %v53_v29  ;;  %v3529_v29 = vcombine.low %v894_v24, %v902_v25 }
  0x39   :  { %4140 = vmatprep.mubr.msk.f32.mxu0 %vm105_vm0, %v54_v30  ;;  %v3530_v30 = vcombine.high %v894_v24, %v902_v25 }
  0x3b   :  { %1826 = vmatprep.subr.bf16.mxu0 %v3530_v30 }
  0x3c   :  { %4141 = vmatmul.mubr.msk.f32.gmra.mrb[24].mxu0 %vm105_vm0, %v55_v31  ;;  %v918_v31 = vld [vmem:[%s5706_s4 + $0xd0] sm:$0xff] }
  0x3d   :  { %4143 = vmatprep.mubr.msk.f32.mxu0 %vm105_vm0, %v56_v32  ;;  %1827 = vmatpush1.bf16.msra.mxu0 %v3529_v29 }
  0x40   :  { %4144 = vmatmul.mubr.msk.f32.gmra.mrb[26].mxu0 %vm105_vm0, %v57_v33  ;;  %v3546_v33 = vcombine.high %v910_v26, %v918_v31 }
  0x41   :  { %4146 = vmatprep.mubr.msk.f32.mxu0 %vm105_vm0, %v58_v34 }
  0x42   :  { %1828 = vmatprep.subr.bf16.mxu0 %v3546_v33 }
  0x44   :  { %4147 = vmatmul.mubr.msk.f32.gmra.mrb[28].mxu0 %vm105_vm0, %v59_v35 }
  0x45   :  { %4149 = vmatprep.mubr.msk.f32.mxu0 %vm105_vm0, %v60_v36 }
  0x48   :  { %4150 = vmatmul.mubr.msk.f32.gmra.mrb[30].mxu0 %vm105_vm0, %v61_v37 }
  0x49   :  { %4152 = vmatprep.mubr.msk.f32.mxu0 %vm105_vm0, %v62_v38  ;;  %v3545_v38 = vcombine.low %v910_v26, %v918_v31 }
  0x4b   :  { %1829 = vmatpush1.bf16.msra.mxu0 %v3545_v38 }
  0x4c   :  { %4153 = vmatmul.mubr.msk.f32.gmra.mrb[32].mxu0 %vm105_vm0, %v63_v39 }
  0x4d   :  { %4155 = vmatprep.mubr.msk.f32.mxu0 %vm105_vm0, %v64_v40 }
  0x50   :  { %4156 = vmatmul.mubr.msk.f32.gmra.mrb[34].mxu0 %vm105_vm0, %v65_v41 }
  0x51   :  { %4158 = vmatprep.mubr.msk.f32.mxu0 %vm105_vm0, %v66_v42 }
  0x54   :  { %4159 = vmatmul.mubr.msk.f32.gmra.mrb[36].mxu0 %vm105_vm0, %v67_v43 }
  0x55   :  { %4161 = vmatprep.mubr.msk.f32.mxu0 %vm105_vm0, %v68_v44 }
  0x58   :  { %4162 = vmatmul.mubr.msk.f32.gmra.mrb[38].mxu0 %vm105_vm0, %v69_v45 }
  0x59   :  { %4164 = vmatprep.mubr.msk.f32.mxu0 %vm105_vm0, %v70_v46 }
  0x5c   :  { %4165 = vmatmul.mubr.msk.f32.gmra.mrb[40].mxu0 %vm105_vm0, %v71_v47 }
  0x5d   :  { %4167 = vmatprep.mubr.msk.f32.mxu0 %vm105_vm0, %v72_v48 }
  0x60   :  { %4168 = vmatmul.mubr.msk.f32.gmra.mrb[42].mxu0 %vm105_vm0, %v73_v49 }
  0x61   :  { %4170 = vmatprep.mubr.msk.f32.mxu0 %vm105_vm0, %v74_v50 }
  0x64   :  { %4171 = vmatmul.mubr.msk.f32.gmra.mrb[44].mxu0 %vm105_vm0, %v75_v51 }
  0x65   :  { %4173 = vmatprep.mubr.msk.f32.mxu0 %vm105_vm0, %v76_v52 }
  0x68   :  { %4174 = vmatmul.mubr.msk.f32.gmra.mrb[46].mxu0 %vm105_vm0, %v77_v53 }
  0x69   :  { %4176 = vmatprep.mubr.msk.f32.mxu0 %vm105_vm0, %v78_v54 }
  0x6c   :  { %4177 = vmatmul.mubr.msk.f32.gmra.mrb[48].mxu0 %vm105_vm0, %v79_v55 }
  0x6d   :  { %4179 = vmatprep.mubr.msk.f32.mxu0 %vm105_vm0, %v80_v56 }
  0x70   :  { %4180 = vmatmul.mubr.msk.f32.gmra.mrb[50].mxu0 %vm105_vm0, %v81_v57 }
  0x71   :  { %4182 = vmatprep.mubr.msk.f32.mxu0 %vm105_vm0, %v82_v58 }
  0x74   :  { %4183 = vmatmul.mubr.msk.f32.gmra.mrb[52].mxu0 %vm105_vm0, %v83_v59 }
  0x75   :  { %4185 = vmatprep.mubr.msk.f32.mxu0 %vm105_vm0, %v84_v60 }
  0x78   :  { %4186 = vmatmul.mubr.msk.f32.gmra.mrb[54].mxu0 %vm105_vm0, %v85_v61 }
  0x79   :  { %4188 = vmatprep.mubr.msk.f32.mxu0 %vm105_vm0, %v86_v62 }
  0x7c   :  { %4189 = vmatmul.mubr.msk.f32.gmra.mrb[56].mxu0 %vm105_vm0, %v87_v63 }
  0x7d   :  { %4191 = vmatprep.mubr.msk.f32.mxu0 %vm105_vm0, %v88_v0 }
  0x80   :  { %4192 = vmatmul.mubr.msk.f32.gmra.mrb[58].mxu0 %vm105_vm0, %v89_v1 }
  0x81   :  { %4194 = vmatprep.mubr.msk.f32.mxu0 %vm105_vm0, %v90_v2 }
  0x84   :  { %4195 = vmatmul.mubr.msk.f32.gmra.mrb[60].mxu0 %vm105_vm0, %v91_v3 }
  0x85   :  { %4197 = vmatprep.mubr.msk.f32.mxu0 %vm105_vm0, %v92_v4 }
  0x88   :  { %4198 = vmatmul.mubr.msk.f32.gmra.mrb[62].mxu0 %vm105_vm0, %v93_v5 }
  0xdf   :  { %v4106_v8 = vpop.f32.mrb[0].mxu0 }
  0xe0   :  { %v370_v9 = vadd.f32 %v4106_v8, %v4721_v7  ;;  %v364_v10 = vpop.f32.mrb[1].mxu0 }
  0xe1   :  { %v365_v11 = vadd.f32 %v4721_v7, %v364_v10 }
  0xe2   :  { %v684_v12 = vmax.f32 %v370_v9, 0.0 }
  0xe3   :  { %v683_v13 = vmax.f32 %v365_v11, 0.0  ;;  %v4109_v14 = vpop.f32.mrb[2].mxu0 }
  0xe4   :  { %v380_v15 = vadd.f32 %v4109_v14, %v4721_v7  ;;  %v374_v16 = vpop.f32.mrb[3].mxu0 }
  0xe5   :  { %v375_v17 = vadd.f32 %v4721_v7, %v374_v16  ;;  %v4727_v18 = vpack.c.bf16 %v684_v12, %v683_v13 }
  0xe6   :  { %v686_v19 = vmax.f32 %v380_v15, 0.0 }
  0xe7   :  { %v685_v20 = vmax.f32 %v375_v17, 0.0  ;;  %v4112_v21 = vpop.f32.mrb[4].mxu0 }
  0xe8   :  { %v390_v22 = vadd.f32 %v4112_v21, %v4721_v7  ;;  %v384_v23 = vpop.f32.mrb[5].mxu0 }
  0xe9   :  { %v4739_v27 = vpack.c.bf16 %v686_v19, %v685_v20  ;;  %v385_v28 = vadd.f32 %v4721_v7, %v384_v23 }
  0xea   :  { %v688_v32 = vmax.f32 %v390_v22, 0.0 }
  0xeb   :  { %v687_v34 = vmax.f32 %v385_v28, 0.0  ;;  %v4115_v35 = vpop.f32.mrb[6].mxu0 }
  0xec   :  { %v400_v36 = vadd.f32 %v4115_v35, %v4721_v7  ;;  %v394_v37 = vpop.f32.mrb[7].mxu0 }
  0xed   :  { %v4746_v39 = vpack.c.bf16 %v688_v32, %v687_v34  ;;  %v395_v40 = vadd.f32 %v4721_v7, %v394_v37 }
  0xee   :  { %v690_v41 = vmax.f32 %v400_v36, 0.0 }
  0xef   :  { %v689_v42 = vmax.f32 %v395_v40, 0.0  ;;  %v4118_v43 = vpop.f32.mrb[8].mxu0 }
  0xf0   :  { %v410_v44 = vadd.f32 %v4118_v43, %v4721_v7  ;;  %v404_v45 = vpop.f32.mrb[9].mxu0 }
  0xf1   :  { %v4750_v46 = vpack.c.bf16 %v690_v41, %v689_v42  ;;  %v405_v47 = vadd.f32 %v4721_v7, %v404_v45 }
  0xf2   :  { %v692_v48 = vmax.f32 %v410_v44, 0.0 }
  0xf3   :  { %v691_v49 = vmax.f32 %v405_v47, 0.0  ;;  %v4121_v50 = vpop.f32.mrb[10].mxu0 }
  0xf4   :  { %v420_v51 = vadd.f32 %v4121_v50, %v4721_v7  ;;  %v414_v52 = vpop.f32.mrb[11].mxu0 }
  0xf5   :  { %v4754_v53 = vpack.c.bf16 %v692_v48, %v691_v49  ;;  %v415_v54 = vadd.f32 %v4721_v7, %v414_v52 }
  0xf6   :  { %v694_v55 = vmax.f32 %v420_v51, 0.0 }
  0xf7   :  { %v693_v56 = vmax.f32 %v415_v54, 0.0  ;;  %v4124_v57 = vpop.f32.mrb[12].mxu0 }
  0xf8   :  { %v430_v58 = vadd.f32 %v4124_v57, %v4721_v7  ;;  %v424_v59 = vpop.f32.mrb[13].mxu0 }
  0xf9   :  { %v4758_v60 = vpack.c.bf16 %v694_v55, %v693_v56  ;;  %v425_v61 = vadd.f32 %v4721_v7, %v424_v59 }
  0xfa   :  { %v696_v62 = vmax.f32 %v430_v58, 0.0 }
  0xfb   :  { %v695_v63 = vmax.f32 %v425_v61, 0.0  ;;  %v4127_v0 = vpop.f32.mrb[14].mxu0 }
  0xfc   :  { %v440_v1 = vadd.f32 %v4127_v0, %v4721_v7  ;;  %v434_v2 = vpop.f32.mrb[15].mxu0 }
  0xfd   :  { %v4762_v3 = vpack.c.bf16 %v696_v62, %v695_v63  ;;  %v435_v4 = vadd.f32 %v4721_v7, %v434_v2 }
  0xfe   :  { %v698_v5 = vmax.f32 %v440_v1, 0.0 }
  0xff   :  { %v697_v6 = vmax.f32 %v435_v4, 0.0  ;;  %v4130_v8 = vpop.f32.mrb[16].mxu0 }
 0x100   :  { %v450_v9 = vadd.f32 %v4130_v8, %v4721_v7  ;;  %v444_v10 = vpop.f32.mrb[17].mxu0 }
 0x101   :  { %v4766_v11 = vpack.c.bf16 %v698_v5, %v697_v6  ;;  %v445_v12 = vadd.f32 %v4721_v7, %v444_v10 }
 0x102   :  { %v700_v13 = vmax.f32 %v450_v9, 0.0 }
 0x103   :  { %v699_v14 = vmax.f32 %v445_v12, 0.0  ;;  %v4133_v15 = vpop.f32.mrb[18].mxu0 }
 0x104   :  { %v460_v16 = vadd.f32 %v4133_v15, %v4721_v7  ;;  %v454_v17 = vpop.f32.mrb[19].mxu0  ;;  %v750_v15 = vld [vmem:[%s5704_s3 + $0x18] sm:$0xff] }
 0x105   :  { %v455_v19 = vadd.f32 %v4721_v7, %v454_v17  ;;  %v4208_v20 = vpack.c.bf16 %v700_v13, %v699_v14  ;;  %v747_v13 = vld [vmem:[%s5704_s3] sm:$0xff] }
 0x106   :  { %v702_v21 = vmax.f32 %v460_v16, 0.0 }
 0x107   :  { %v701_v22 = vmax.f32 %v455_v19, 0.0  ;;  %v4136_v23 = vpop.f32.mrb[20].mxu0  ;;  %4209 = vmatprep.subr.bf16.mxu1 %v4208_v20 }
 0x108   :  { %v470_v24 = vadd.f32 %v4136_v23, %v4721_v7  ;;  %v464_v25 = vpop.f32.mrb[21].mxu0  ;;  %4211 = vmatpush3.bf16.msra.mxu1 %v4727_v18 }
 0x109   :  { %v4212_v26 = vpack.c.bf16 %v702_v21, %v701_v22  ;;  %v465_v28 = vadd.f32 %v4721_v7, %v464_v25 }
 0x10a   :  { %v704_v29 = vmax.f32 %v470_v24, 0.0 }
 0x10b   :  { %v703_v30 = vmax.f32 %v465_v28, 0.0  ;;  %v4139_v31 = vpop.f32.mrb[22].mxu0  ;;  %4213 = vmatprep.subr.bf16.mxu1 %v4212_v26 }
 0x10c   :  { %v480_v32 = vadd.f32 %v4139_v31, %v4721_v7  ;;  %v474_v33 = vpop.f32.mrb[23].mxu0  ;;  %4215 = vmatpush3.bf16.msra.mxu1 %v4739_v27 }
 0x10d   :  { %v4216_v34 = vpack.c.bf16 %v704_v29, %v703_v30  ;;  %v475_v35 = vadd.f32 %v4721_v7, %v474_v33 }
 0x10e   :  { %v706_v36 = vmax.f32 %v480_v32, 0.0 }
 0x10f   :  { %v705_v37 = vmax.f32 %v475_v35, 0.0  ;;  %v4142_v38 = vpop.f32.mrb[24].mxu0  ;;  %4217 = vmatprep.subr.bf16.mxu1 %v4216_v34 }
 0x110   :  { %v490_v18 = vadd.f32 %v4142_v38, %v4721_v7  ;;  %v484_v40 = vpop.f32.mrb[25].mxu0  ;;  %4219 = vmatpush3.bf16.msra.mxu1 %v4746_v39 }
 0x111   :  { %v4220_v41 = vpack.c.bf16 %v706_v36, %v705_v37  ;;  %v485_v42 = vadd.f32 %v4721_v7, %v484_v40 }
 0x112   :  { %v708_v43 = vmax.f32 %v490_v18, 0.0 }
 0x113   :  { %v707_v44 = vmax.f32 %v485_v42, 0.0  ;;  %v4145_v45 = vpop.f32.mrb[26].mxu0  ;;  %4221 = vmatprep.subr.bf16.mxu1 %v4220_v41 }
 0x114   :  { %v500_v27 = vadd.f32 %v4145_v45, %v4721_v7  ;;  %v494_v47 = vpop.f32.mrb[27].mxu0  ;;  %4223 = vmatpush3.bf16.msra.mxu1 %v4750_v46 }
 0x115   :  { %v4224_v48 = vpack.c.bf16 %v708_v43, %v707_v44  ;;  %v495_v49 = vadd.f32 %v4721_v7, %v494_v47 }
 0x116   :  { %v710_v50 = vmax.f32 %v500_v27, 0.0 }
 0x117   :  { %v709_v51 = vmax.f32 %v495_v49, 0.0  ;;  %v4148_v52 = vpop.f32.mrb[28].mxu0  ;;  %4225 = vmatprep.subr.bf16.mxu1 %v4224_v48 }
 0x118   :  { %v510_v39 = vadd.f32 %v4148_v52, %v4721_v7  ;;  %v504_v54 = vpop.f32.mrb[29].mxu0  ;;  %4227 = vmatpush3.bf16.msra.mxu1 %v4754_v53 }
 0x119   :  { %v4228_v55 = vpack.c.bf16 %v710_v50, %v709_v51  ;;  %v505_v56 = vadd.f32 %v4721_v7, %v504_v54 }
 0x11a   :  { %v712_v57 = vmax.f32 %v510_v39, 0.0 }
 0x11b   :  { %v711_v58 = vmax.f32 %v505_v56, 0.0  ;;  %v4151_v59 = vpop.f32.mrb[30].mxu0  ;;  %4229 = vmatprep.subr.bf16.mxu1 %v4228_v55 }
 0x11c   :  { %v520_v46 = vadd.f32 %v4151_v59, %v4721_v7  ;;  %v514_v61 = vpop.f32.mrb[31].mxu0  ;;  %4231 = vmatpush3.bf16.msra.mxu1 %v4758_v60 }
 0x11d   :  { %v4232_v62 = vpack.c.bf16 %v712_v57, %v711_v58  ;;  %v515_v63 = vadd.f32 %v4721_v7, %v514_v61 }
 0x11e   :  { %v714_v0 = vmax.f32 %v520_v46, 0.0 }
 0x11f   :  { %v713_v1 = vmax.f32 %v515_v63, 0.0  ;;  %v4154_v2 = vpop.f32.mrb[32].mxu0  ;;  %4233 = vmatprep.subr.bf16.mxu1 %v4232_v62 }
 0x120   :  { %v530_v53 = vadd.f32 %v4154_v2, %v4721_v7  ;;  %v524_v4 = vpop.f32.mrb[33].mxu0  ;;  %4235 = vmatpush3.bf16.msra.mxu1 %v4762_v3 }
 0x121   :  { %v4236_v5 = vpack.c.bf16 %v714_v0, %v713_v1  ;;  %v525_v6 = vadd.f32 %v4721_v7, %v524_v4 }
 0x122   :  { %v716_v8 = vmax.f32 %v530_v53, 0.0 }
 0x123   :  { %v715_v9 = vmax.f32 %v525_v6, 0.0  ;;  %v4157_v10 = vpop.f32.mrb[34].mxu0  ;;  %4237 = vmatprep.subr.bf16.mxu1 %v4236_v5 }
 0x124   :  { %v540_v60 = vadd.f32 %v4157_v10, %v4721_v7  ;;  %v534_v12 = vpop.f32.mrb[35].mxu0  ;;  %4239 = vmatpush3.bf16.msra.mxu1 %v4766_v11 }
 0x125   :  { %v4797_v14 = vpack.c.bf16 %v716_v8, %v715_v9  ;;  %v535_v3 = vadd.f32 %v4721_v7, %v534_v12 }
 0x126   :  { %v718_v16 = vmax.f32 %v540_v60, 0.0 }
 0x127   :  { %v717_v17 = vmax.f32 %v535_v3, 0.0  ;;  %v4160_v19 = vpop.f32.mrb[36].mxu0  ;;  %816 = vmatmul.mubr.f32.vlgmr.msra.gmra.mrb[0].mxu1 %v747_v13 }
 0x128   :  { %v550_v20 = vadd.f32 %v4160_v19, %v4721_v7  ;;  %v544_v21 = vpop.f32.mrb[37].mxu0  ;;  %885 = vmatprep.mubr.f32.mxu1 %v750_v15 }
 0x129   :  { %v4804_v11 = vpack.c.bf16 %v718_v16, %v717_v17  ;;  %v545_v22 = vadd.f32 %v4721_v7, %v544_v21 }
 0x12a   :  { %v720_v23 = vmax.f32 %v550_v20, 0.0 }
 0x12b   :  { %v719_v24 = vmax.f32 %v545_v22, 0.0  ;;  %v4163_v25 = vpop.f32.mrb[38].mxu0 }
 0x12c   :  { %v560_v26 = vadd.f32 %v4163_v25, %v4721_v7  ;;  %v554_v28 = vpop.f32.mrb[39].mxu0 }
 0x12d   :  { %v4808_v29 = vpack.c.bf16 %v720_v23, %v719_v24  ;;  %v555_v30 = vadd.f32 %v4721_v7, %v554_v28 }
 0x12e   :  { %v722_v31 = vmax.f32 %v560_v26, 0.0 }
 0x12f   :  { %v721_v32 = vmax.f32 %v555_v30, 0.0  ;;  %v4166_v33 = vpop.f32.mrb[40].mxu0 }
 0x130   :  { %v570_v34 = vadd.f32 %v4166_v33, %v4721_v7  ;;  %v564_v35 = vpop.f32.mrb[41].mxu0 }
 0x131   :  { %v4812_v36 = vpack.c.bf16 %v722_v31, %v721_v32  ;;  %v565_v37 = vadd.f32 %v4721_v7, %v564_v35 }
 0x132   :  { %v724_v38 = vmax.f32 %v570_v34, 0.0 }
 0x133   :  { %v723_v18 = vmax.f32 %v565_v37, 0.0  ;;  %v4169_v40 = vpop.f32.mrb[42].mxu0 }
 0x134   :  { %v580_v41 = vadd.f32 %v4169_v40, %v4721_v7  ;;  %v574_v42 = vpop.f32.mrb[43].mxu0 }
 0x135   :  { %v4816_v43 = vpack.c.bf16 %v724_v38, %v723_v18  ;;  %v575_v44 = vadd.f32 %v4721_v7, %v574_v42 }
 0x136   :  { %v726_v45 = vmax.f32 %v580_v41, 0.0 }
 0x137   :  { %v725_v27 = vmax.f32 %v575_v44, 0.0  ;;  %v4172_v47 = vpop.f32.mrb[44].mxu0 }
 0x138   :  { %v590_v48 = vadd.f32 %v4172_v47, %v4721_v7  ;;  %v584_v49 = vpop.f32.mrb[45].mxu0 }
 0x139   :  { %v4820_v50 = vpack.c.bf16 %v726_v45, %v725_v27  ;;  %v585_v51 = vadd.f32 %v4721_v7, %v584_v49 }
 0x13a   :  { %v728_v52 = vmax.f32 %v590_v48, 0.0 }
 0x13b   :  { %v727_v39 = vmax.f32 %v585_v51, 0.0  ;;  %v4175_v54 = vpop.f32.mrb[46].mxu0 }
 0x13c   :  { %v600_v55 = vadd.f32 %v4175_v54, %v4721_v7  ;;  %v594_v56 = vpop.f32.mrb[47].mxu0 }
 0x13d   :  { %v4824_v57 = vpack.c.bf16 %v728_v52, %v727_v39  ;;  %v595_v58 = vadd.f32 %v4721_v7, %v594_v56  ;;  %v749_v56 = vld [vmem:[%s5704_s3 + $0x10] sm:$0xff] }
 0x13e   :  { %v730_v59 = vmax.f32 %v600_v55, 0.0 }
 0x13f   :  { %v729_v46 = vmax.f32 %v595_v58, 0.0  ;;  %v4178_v61 = vpop.f32.mrb[48].mxu0 }
 0x140   :  { %v610_v62 = vadd.f32 %v4178_v61, %v4721_v7  ;;  %v604_v63 = vpop.f32.mrb[49].mxu0  ;;  %v908_v61 = vld [vmem:[%s5706_s4 + $0x80] sm:$0xff] }
 0x141   :  { %v4828_v0 = vpack.c.bf16 %v730_v59, %v729_v46  ;;  %v605_v1 = vadd.f32 %v4721_v7, %v604_v63  ;;  %v900_v46 = vld [vmem:[%s5706_s4 + $0x40] sm:$0xff] }
 0x142   :  { %v732_v2 = vmax.f32 %v610_v62, 0.0  ;;  %v916_v62 = vld [vmem:[%s5706_s4 + $0xc0] sm:$0xff] }
 0x143   :  { %v731_v53 = vmax.f32 %v605_v1, 0.0  ;;  %v4181_v4 = vpop.f32.mrb[50].mxu0  ;;  %v3542_v1 = vcombine.high %v908_v61, %v916_v62 }
 0x144   :  { %v620_v5 = vadd.f32 %v4181_v4, %v4721_v7  ;;  %v614_v6 = vpop.f32.mrb[51].mxu0  ;;  %v942_v4 = vld [vmem:[%s5706_s4 + $0x190] sm:$0xff] }
 0x145   :  { %v4240_v8 = vpack.c.bf16 %v732_v2, %v731_v53  ;;  %v615_v9 = vadd.f32 %v4721_v7, %v614_v6  ;;  %v924_v2 = vld [vmem:[%s5706_s4 + $0x100] sm:$0xff] }
 0x146   :  { %v734_v10 = vmax.f32 %v620_v5, 0.0  ;;  %v932_v53 = vld [vmem:[%s5706_s4 + $0x140] sm:$0xff]  ;;  %v950_v5 = vld [vmem:[%s5706_s4 + $0x1d0] sm:$0xff] }
 0x147   :  { %v733_v60 = vmax.f32 %v615_v9, 0.0  ;;  %v4184_v12 = vpop.f32.mrb[52].mxu0  ;;  %4241 = vmatprep.subr.bf16.mxu1 %v4240_v8  ;;  %v3577_v6 = vcombine.low %v942_v4, %v950_v5  ;;  %v958_v8 = vld [vmem:[%s5706_s4 + $0x210] sm:$0xff]  ;;  %v3541_v9 = vcombine.low %v908_v61, %v916_v62  ;;  %v909_v62 = vld [vmem:[%s5706_s4 + $0x88] sm:$0xff] }
 0x148   :  { %v630_v13 = vadd.f32 %v4184_v12, %v4721_v7  ;;  %v624_v3 = vpop.f32.mrb[53].mxu0  ;;  %4243 = vmatpush3.bf16.msra.mxu1 %v4797_v14  ;;  %v3558_v12 = vcombine.high %v924_v2, %v932_v53 }
 0x149   :  { %v4244_v15 = vpack.c.bf16 %v734_v10, %v733_v60  ;;  %v625_v16 = vadd.f32 %v4721_v7, %v624_v3  ;;  %v3578_v10 = vcombine.high %v942_v4, %v950_v5  ;;  %v966_v60 = vld [vmem:[%s5706_s4 + $0x250] sm:$0xff] }
 0x14a   :  { %v736_v17 = vmax.f32 %v630_v13, 0.0  ;;  %v3594_v13 = vcombine.high %v958_v8, %v966_v60  ;;  %v974_v3 = vld [vmem:[%s5706_s4 + $0x290] sm:$0xff] }
 0x14b   :  { %v735_v19 = vmax.f32 %v625_v16, 0.0  ;;  %v4187_v20 = vpop.f32.mrb[54].mxu0  ;;  %4245 = vmatprep.subr.bf16.mxu1 %v4244_v15  ;;  %v982_v15 = vld [vmem:[%s5706_s4 + $0x2d0] sm:$0xff]  ;;  %v940_v16 = vld [vmem:[%s5706_s4 + $0x180] sm:$0xff] }
 0x14c   :  { %v640_v21 = vadd.f32 %v4187_v20, %v4721_v7  ;;  %v634_v22 = vpop.f32.mrb[55].mxu0  ;;  %4247 = vmatpush3.bf16.msra.mxu1 %v4804_v11  ;;  %v3557_v20 = vcombine.low %v924_v2, %v932_v53 }
 0x14d   :  { %v4248_v23 = vpack.c.bf16 %v736_v17, %v735_v19  ;;  %v635_v24 = vadd.f32 %v4721_v7, %v634_v22  ;;  %v948_v17 = vld [vmem:[%s5706_s4 + $0x1c0] sm:$0xff]  ;;  %v3593_v19 = vcombine.low %v958_v8, %v966_v60  ;;  %v933_v8 = vld [vmem:[%s5706_s4 + $0x148] sm:$0xff] }
 0x14e   :  { %v738_v25 = vmax.f32 %v640_v21, 0.0  ;;  %v3610_v21 = vcombine.high %v974_v3, %v982_v15  ;;  %v3574_v22 = vcombine.high %v940_v16, %v948_v17 }
 0x14f   :  { %v737_v26 = vmax.f32 %v635_v24, 0.0  ;;  %v4190_v28 = vpop.f32.mrb[56].mxu0  ;;  %4249 = vmatprep.subr.bf16.mxu1 %v4248_v23  ;;  %v990_v23 = vld [vmem:[%s5706_s4 + $0x310] sm:$0xff] }
 0x150   :  { %v650_v14 = vadd.f32 %v4190_v28, %v4721_v7  ;;  %v644_v30 = vpop.f32.mrb[57].mxu0  ;;  %4251 = vmatpush3.bf16.msra.mxu1 %v4808_v29  ;;  %v998_v24 = vld [vmem:[%s5706_s4 + $0x350] sm:$0xff]  ;;  %v3609_v28 = vcombine.low %v974_v3, %v982_v15  ;;  %v949_v3 = vld [vmem:[%s5706_s4 + $0x1c8] sm:$0xff] }
 0x151   :  { %v4252_v31 = vpack.c.bf16 %v738_v25, %v737_v26  ;;  %v645_v32 = vadd.f32 %v4721_v7, %v644_v30  ;;  %v956_v25 = vld [vmem:[%s5706_s4 + $0x200] sm:$0xff]  ;;  %v3626_v30 = vcombine.high %v990_v23, %v998_v24 }
 0x152   :  { %v740_v33 = vmax.f32 %v650_v14, 0.0  ;;  %v964_v26 = vld [vmem:[%s5706_s4 + $0x240] sm:$0xff]  ;;  %v3573_v14 = vcombine.low %v940_v16, %v948_v17 }
 0x153   :  { %v739_v34 = vmax.f32 %v645_v32, 0.0  ;;  %v4193_v35 = vpop.f32.mrb[58].mxu0  ;;  %4253 = vmatprep.subr.bf16.mxu1 %v4252_v31  ;;  %v3590_v31 = vcombine.high %v956_v25, %v964_v26  ;;  %v972_v32 = vld [vmem:[%s5706_s4 + $0x280] sm:$0xff] }
 0x154   :  { %v660_v11 = vadd.f32 %v4193_v35, %v4721_v7  ;;  %v654_v37 = vpop.f32.mrb[59].mxu0  ;;  %4255 = vmatpush3.bf16.msra.mxu1 %v4812_v36  ;;  %v3589_v35 = vcombine.low %v956_v25, %v964_v26  ;;  %v944_v17 = vld [vmem:[%s5706_s4 + $0x1a0] sm:$0xff] }
 0x155   :  { %v4256_v38 = vpack.c.bf16 %v740_v33, %v739_v34  ;;  %v655_v18 = vadd.f32 %v4721_v7, %v654_v37  ;;  %v980_v33 = vld [vmem:[%s5706_s4 + $0x2c0] sm:$0xff]  ;;  %v3625_v34 = vcombine.low %v990_v23, %v998_v24  ;;  %v965_v23 = vld [vmem:[%s5706_s4 + $0x248] sm:$0xff] }
 0x156   :  { %v742_v40 = vmax.f32 %v660_v11, 0.0  ;;  %v3606_v11 = vcombine.high %v972_v32, %v980_v33  ;;  %v988_v37 = vld [vmem:[%s5706_s4 + $0x300] sm:$0xff] }
 0x157   :  { %v741_v41 = vmax.f32 %v655_v18, 0.0  ;;  %v4196_v42 = vpop.f32.mrb[60].mxu0  ;;  %4257 = vmatprep.subr.bf16.mxu1 %v4256_v38  ;;  %v996_v38 = vld [vmem:[%s5706_s4 + $0x340] sm:$0xff]  ;;  %v3605_v18 = vcombine.low %v972_v32, %v980_v33  ;;  %v981_v32 = vld [vmem:[%s5706_s4 + $0x2c8] sm:$0xff] }
 0x158   :  { %v670_v29 = vadd.f32 %v4196_v42, %v4721_v7  ;;  %v664_v44 = vpop.f32.mrb[61].mxu0  ;;  %4259 = vmatpush3.bf16.msra.mxu1 %v4816_v43  ;;  %v1004_v42 = vld [vmem:[%s5706_s4 + $0x380] sm:$0xff] }
 0x159   :  { %v4260_v45 = vpack.c.bf16 %v742_v40, %v741_v41  ;;  %v665_v27 = vadd.f32 %v4721_v7, %v664_v44  ;;  %v3622_v40 = vcombine.high %v988_v37, %v996_v38  ;;  %v3621_v41 = vcombine.low %v988_v37, %v996_v38  ;;  %v1006_v44 = vld [vmem:[%s5706_s4 + $0x390] sm:$0xff]  ;;  %v960_v26 = vld [vmem:[%s5706_s4 + $0x220] sm:$0xff] }
 0x15a   :  { %v744_v47 = vmax.f32 %v670_v29, 0.0  ;;  %v1012_v29 = vld [vmem:[%s5706_s4 + $0x3c0] sm:$0xff] }
 0x15b   :  { %v743_v48 = vmax.f32 %v665_v27, 0.0  ;;  %v4199_v49 = vpop.f32.mrb[62].mxu0  ;;  %4261 = vmatprep.subr.bf16.mxu1 %v4260_v45  ;;  %v3638_v45 = vcombine.high %v1004_v42, %v1012_v29  ;;  %v1014_v27 = vld [vmem:[%s5706_s4 + $0x3d0] sm:$0xff] }
 0x15c   :  { %v680_v36 = vadd.f32 %v4199_v49, %v4721_v7  ;;  %v674_v51 = vpop.f32.mrb[63].mxu0  ;;  %4263 = vmatpush3.bf16.msra.mxu1 %v4820_v50  ;;  %v926_v50 = vld [vmem:[%s5706_s4 + $0x110] sm:$0xff]  ;;  %v3642_v49 = vcombine.high %v1006_v44, %v1014_v27 }
 0x15d   :  { %v4264_v52 = vpack.c.bf16 %v744_v47, %v743_v48  ;;  %v675_v39 = vadd.f32 %v4721_v7, %v674_v51  ;;  %v934_v7 = vld [vmem:[%s5706_s4 + $0x150] sm:$0xff]  ;;  %v3637_v47 = vcombine.low %v1004_v42, %v1012_v29  ;;  %v3641_v48 = vcombine.low %v1006_v44, %v1014_v27  ;;  %v901_v51 = vld [vmem:[%s5706_s4 + $0x48] sm:$0xff]  ;;  %v1000_v42 = vld [vmem:[%s5706_s4 + $0x360] sm:$0xff] }
 0x15e   :  { %v746_v54 = vmax.f32 %v680_v36, 0.0  ;;  %v3561_v58 = vcombine.low %v926_v50, %v934_v7  ;;  %v3562_v59 = vcombine.high %v926_v50, %v934_v7  ;;  %v893_v36 = vld [vmem:[%s5706_s4 + $0x8] sm:$0xff]  ;;  %v4401_v50 = vmov 0  }
 0x15f   :  { %v745_v55 = vmax.f32 %v675_v39, 0.0  ;;  %4265 = vmatprep.subr.bf16.mxu1 %v4264_v52  ;;  %v896_v52 = vld [vmem:[%s5706_s4 + $0x20] sm:$0xff]  ;;  %v3528_v39 = vcombine.high %v893_v36, %v901_v51  ;;  %1858 = vmatprep.mubr.bf16.mxu0 %v4401_v50 }
 0x160   :  { %4267 = vmatpush3.bf16.msra.mxu1 %v4824_v57  ;;  %v892_v57 = vld [vmem:[%s5706_s4] sm:$0xff]  ;;  %1830 = vmatprep.subr.bf16.mxu0 %v3562_v59 }
 0x161   :  { %v4268_v43 = vpack.c.bf16 %v746_v54, %v745_v55  ;;  %v3525_v63 = vcombine.low %v892_v57, %v900_v46  ;;  %1831 = vmatpush1.bf16.msra.mxu0 %v3561_v58  ;;  %v904_v54 = vld [vmem:[%s5706_s4 + $0x60] sm:$0xff]  ;;  %v3527_v55 = vcombine.low %v893_v36, %v901_v51 }
 0x162   :  { %1832 = vmatprep.subr.bf16.mxu0 %v3578_v10  ;;  %v936_v10 = vld [vmem:[%s5706_s4 + $0x160] sm:$0xff] }
 0x163   :  { %4269 = vmatprep.subr.bf16.mxu1 %v4268_v43  ;;  %v3533_v43 = vcombine.low %v896_v52, %v904_v54  ;;  %v1016_v36 = vld [vmem:[%s5706_s4 + $0x3e0] sm:$0xff] }
 0x164   :  { %4271 = vmatpush3.bf16.msra.mxu1 %v4828_v0  ;;  %v3526_v0 = vcombine.high %v892_v57, %v900_v46 }
 0x165   :  { %1833 = vmatpush1.bf16.msra.mxu0 %v3577_v6  ;;  %v925_v6 = vld [vmem:[%s5706_s4 + $0x108] sm:$0xff] }
 0x166   :  { %1744 = vmatprep.subr.bf16.mxu1 %v3526_v0  ;;  %1834 = vmatprep.subr.bf16.mxu0 %v3594_v13  ;;  %v912_v0 = vld [vmem:[%s5706_s4 + $0xa0] sm:$0xff]  ;;  %v941_v13 = vld [vmem:[%s5706_s4 + $0x188] sm:$0xff]  ;;  %v3560_v15 = vcombine.high %v925_v6, %v933_v8 }
 0x167   :  { %886 = vmatmul.mubr.f32.vlgmr.msra.gmra.mrb[2].mxu1 %v749_v56  ;;  %v3534_v56 = vcombine.high %v896_v52, %v904_v54  ;;  %v3576_v24 = vcombine.high %v941_v13, %v949_v3 }
 0x168   :  { %1745 = vmatpush1.bf16.msra.mxu1 %v3525_v63  ;;  %1776 = vmatprep.mubr.bf16.mxu1 %v4401_v50  ;;  %v917_v63 = vld [vmem:[%s5706_s4 + $0xc8] sm:$0xff] }
 0x169   :  { %1746 = vmatprep.subr.bf16.mxu1 %v3542_v1  ;;  %1835 = vmatpush1.bf16.msra.mxu0 %v3593_v19  ;;  %v920_v1 = vld [vmem:[%s5706_s4 + $0xe0] sm:$0xff]  ;;  %v3544_v4 = vcombine.high %v909_v62, %v917_v63  ;;  %v3543_v60 = vcombine.low %v909_v62, %v917_v63  ;;  %v919_v62 = vld [vmem:[%s5706_s4 + $0xd8] sm:$0xff]  ;;  %v914_v63 = vld [vmem:[%s5706_s4 + $0xb0] sm:$0xff] }
 0x16a   :  { %1836 = vmatprep.subr.bf16.mxu0 %v3610_v21  ;;  %v3550_v5 = vcombine.high %v912_v0, %v920_v1  ;;  %v952_v19 = vld [vmem:[%s5706_s4 + $0x1e0] sm:$0xff] }
 0x16b   :  { %v3582_v25 = vcombine.high %v944_v17, %v952_v19 }
 0x16c   :  { %1747 = vmatpush1.bf16.msra.mxu1 %v3541_v9  ;;  %v928_v9 = vld [vmem:[%s5706_s4 + $0x120] sm:$0xff] }
 0x16d   :  { %1748 = vmatprep.subr.bf16.mxu1 %v3558_v12  ;;  %1837 = vmatpush1.bf16.msra.mxu0 %v3609_v28  ;;  %v3549_v12 = vcombine.low %v912_v0, %v920_v1  ;;  %v3566_v16 = vcombine.high %v928_v9, %v936_v10  ;;  %v3565_v21 = vcombine.low %v928_v9, %v936_v10  ;;  %v968_v28 = vld [vmem:[%s5706_s4 + $0x260] sm:$0xff]  ;;  %v922_v0 = vld [vmem:[%s5706_s4 + $0xf0] sm:$0xff] }
 0x16e   :  { %1838 = vmatprep.subr.bf16.mxu0 %v3626_v30  ;;  %v3581_v30 = vcombine.low %v944_v17, %v952_v19  ;;  %v3597_v38 = vcombine.low %v960_v26, %v968_v28  ;;  %v930_v9 = vld [vmem:[%s5706_s4 + $0x130] sm:$0xff] }
 0x16f   :  { %v938_v10 = vld [vmem:[%s5706_s4 + $0x170] sm:$0xff] }
 0x170   :  { %1749 = vmatpush1.bf16.msra.mxu1 %v3557_v20  ;;  %v3559_v20 = vcombine.low %v925_v6, %v933_v8  ;;  %v927_v6 = vld [vmem:[%s5706_s4 + $0x118] sm:$0xff]  ;;  %v946_v17 = vld [vmem:[%s5706_s4 + $0x1b0] sm:$0xff] }
 0x171   :  { %1750 = vmatprep.subr.bf16.mxu1 %v3574_v22  ;;  %1839 = vmatpush1.bf16.msra.mxu0 %v3625_v34  ;;  %v957_v22 = vld [vmem:[%s5706_s4 + $0x208] sm:$0xff]  ;;  %v3598_v34 = vcombine.high %v960_v26, %v968_v28  ;;  %v935_v8 = vld [vmem:[%s5706_s4 + $0x158] sm:$0xff]  ;;  %v954_v19 = vld [vmem:[%s5706_s4 + $0x1f0] sm:$0xff] }
 0x172   :  { %1840 = vmatprep.subr.bf16.mxu0 %v3642_v49  ;;  %v3592_v33 = vcombine.high %v957_v22, %v965_v23  ;;  %v3591_v37 = vcombine.low %v957_v22, %v965_v23  ;;  %v1008_v49 = vld [vmem:[%s5706_s4 + $0x3a0] sm:$0xff]  ;;  %v3563_v22 = vcombine.low %v927_v6, %v935_v8  ;;  %v3569_v23 = vcombine.low %v930_v9, %v938_v10  ;;  %v962_v26 = vld [vmem:[%s5706_s4 + $0x230] sm:$0xff] }
 0x173   :  { %v970_v28 = vld [vmem:[%s5706_s4 + $0x270] sm:$0xff] }
 0x174   :  { %1751 = vmatpush1.bf16.msra.mxu1 %v3573_v14  ;;  %v3575_v14 = vcombine.low %v941_v13, %v949_v3  ;;  %v3553_v3 = vcombine.low %v914_v63, %v922_v0 }
 0x175   :  { %1752 = vmatprep.subr.bf16.mxu1 %v3590_v31  ;;  %1841 = vmatpush1.bf16.msra.mxu0 %v3641_v48  ;;  %v973_v31 = vld [vmem:[%s5706_s4 + $0x288] sm:$0xff] }
 0x176   :  { %1908 = vmatprep.subr.bf16.mxu0 %v3534_v56  ;;  %v3608_v29 = vcombine.high %v973_v31, %v981_v32  ;;  %v1013_v48 = vld [vmem:[%s5706_s4 + $0x3c8] sm:$0xff]  ;;  %v898_v56 = vld [vmem:[%s5706_s4 + $0x30] sm:$0xff] }
 0x178   :  { %1753 = vmatpush1.bf16.msra.mxu1 %v3589_v35  ;;  %v976_v35 = vld [vmem:[%s5706_s4 + $0x2a0] sm:$0xff] }
 0x179   :  { %1754 = vmatprep.subr.bf16.mxu1 %v3606_v11  ;;  %v984_v11 = vld [vmem:[%s5706_s4 + $0x2e0] sm:$0xff] }
 0x17a   :  { %v3614_v44 = vcombine.high %v976_v35, %v984_v11  ;;  %v3613_v27 = vcombine.low %v976_v35, %v984_v11  ;;  %v978_v35 = vld [vmem:[%s5706_s4 + $0x2b0] sm:$0xff] }
 0x17b   :  { %v986_v11 = vld [vmem:[%s5706_s4 + $0x2f0] sm:$0xff] }
 0x17c   :  { %1755 = vmatpush1.bf16.msra.mxu1 %v3605_v18  ;;  %v989_v18 = vld [vmem:[%s5706_s4 + $0x308] sm:$0xff] }
 0x17d   :  { %1756 = vmatprep.subr.bf16.mxu1 %v3622_v40  ;;  %v997_v40 = vld [vmem:[%s5706_s4 + $0x348] sm:$0xff] }
 0x17e   :  { %v3624_v51 = vcombine.high %v989_v18, %v997_v40 }
 0x180   :  { %1757 = vmatpush1.bf16.msra.mxu1 %v3621_v41  ;;  %v992_v41 = vld [vmem:[%s5706_s4 + $0x320] sm:$0xff] }
 0x181   :  { %1758 = vmatprep.subr.bf16.mxu1 %v3638_v45  ;;  %v3607_v45 = vcombine.low %v973_v31, %v981_v32  ;;  %v3630_v52 = vcombine.high %v992_v41, %v1000_v42  ;;  %v3629_v54 = vcombine.low %v992_v41, %v1000_v42  ;;  %v3585_v32 = vcombine.low %v946_v17, %v954_v19  ;;  %v991_v41 = vld [vmem:[%s5706_s4 + $0x318] sm:$0xff] }
 0x182   :  { %v999_v42 = vld [vmem:[%s5706_s4 + $0x358] sm:$0xff] }
 0x184   :  { %1759 = vmatpush1.bf16.msra.mxu1 %v3637_v47  ;;  %v1005_v47 = vld [vmem:[%s5706_s4 + $0x388] sm:$0xff] }
 0x185   :  { %1785 = vmatprep.subr.bf16.mxu1 %v3528_v39  ;;  %v3623_v39 = vcombine.low %v989_v18, %v997_v40  ;;  %v3601_v40 = vcombine.low %v962_v26, %v970_v28 }
 0x1fa   :  { %v3882_v7 = vpop.f32.mrb[0].mxu1 }
 0x1fb   :  { %v3883_v57 = vpop.f32.mrb[1].mxu1 }
 0x1fc   :  { %v3884_v58 = vadd.f32 %v3883_v57, %v3882_v7  ;;  %v906_v7 = vld [vmem:[%s5706_s4 + $0x70] sm:$0xff]  ;;  %v3640_v57 = vcombine.high %v1005_v47, %v1013_v48 }
 0x23a   :  { %v3917_v59 = vpop.f32.mrb[2].mxu1 }
 0x23b   :  { %v3918_v46 = vpop.f32.mrb[3].mxu1 }
 0x23c   :  { %v3919_v61 = vadd.f32 %v3918_v46, %v3917_v59  ;;  %v3639_v59 = vcombine.low %v1005_v47, %v1013_v48  ;;  %v3645_v46 = vcombine.low %v1008_v49, %v1016_v36  ;;  %v3617_v48 = vcombine.low %v978_v35, %v986_v11 }
 0x23e   :  { %v888_v2 = vadd.f32 %v3919_v61, %v3884_v58  ;;  %v3646_v58 = vcombine.high %v1008_v49, %v1016_v36  ;;  %v911_v61 = vld [vmem:[%s5706_s4 + $0x98] sm:$0xff] }
 0x23f   :  { %v3547_v13 = vcombine.low %v911_v61, %v919_v62  ;;  %v1007_v49 = vld [vmem:[%s5706_s4 + $0x398] sm:$0xff] }
 0x240   :  { %v4966_v53 = vpack.c.bf16 %v888_v2, %v888_v2  ;;  %v3538_v2 = vcombine.high %v898_v56, %v906_v7  ;;  %v1015_v36 = vld [vmem:[%s5706_s4 + $0x3d8] sm:$0xff] }
 0x242   :  { %1777 = vmatmul.mubr.bf16.vlgmr.msra.gmra.mrb[4].mxu1 %v4966_v53  ;;  %1859 = vmatmul.mubr.bf16.vlgmr.msra.gmra.mrb[64].mxu0 %v4966_v53 }
 0x243   :  { %1786 = vmatpush1.bf16.msra.mxu1 %v3527_v55  ;;  %1909 = vmatpush1.bf16.msra.mxu0 %v3533_v43  ;;  %v895_v55 = vld [vmem:[%s5706_s4 + $0x18] sm:$0xff] }
 0x244   :  { %1787 = vmatprep.subr.bf16.mxu1 %v3544_v4  ;;  %1910 = vmatprep.subr.bf16.mxu0 %v3550_v5  ;;  %v903_v43 = vld [vmem:[%s5706_s4 + $0x58] sm:$0xff]  ;;  %v3537_v5 = vcombine.low %v898_v56, %v906_v7  ;;  %v897_v56 = vld [vmem:[%s5706_s4 + $0x28] sm:$0xff] }
 0x245   :  { %1817 = vmatprep.mubr.bf16.mxu1 %v4401_v50  ;;  %1940 = vmatprep.mubr.bf16.mxu0 %v4401_v50  ;;  %v3532_v1 = vcombine.high %v895_v55, %v903_v43  ;;  %v3531_v4 = vcombine.low %v895_v55, %v903_v43  ;;  %v3627_v55 = vcombine.low %v991_v41, %v999_v42  ;;  %v905_v7 = vld [vmem:[%s5706_s4 + $0x68] sm:$0xff] }
 0x247   :  { %1788 = vmatpush1.bf16.msra.mxu1 %v3543_v60  ;;  %1911 = vmatpush1.bf16.msra.mxu0 %v3549_v12  ;;  %v3548_v60 = vcombine.high %v911_v61, %v919_v62  ;;  %v3554_v12 = vcombine.high %v914_v63, %v922_v0  ;;  %v913_v62 = vld [vmem:[%s5706_s4 + $0xa8] sm:$0xff]  ;;  %v3536_v0 = vcombine.high %v897_v56, %v905_v7 }
 0x248   :  { %1789 = vmatprep.subr.bf16.mxu1 %v3560_v15  ;;  %1912 = vmatprep.subr.bf16.mxu0 %v3566_v16  ;;  %v943_v15 = vld [vmem:[%s5706_s4 + $0x198] sm:$0xff]  ;;  %v921_v63 = vld [vmem:[%s5706_s4 + $0xe8] sm:$0xff] }
 0x249   :  { %v951_v16 = vld [vmem:[%s5706_s4 + $0x1d8] sm:$0xff] }
 0x24a   :  { %v3579_v31 = vcombine.low %v943_v15, %v951_v16 }
 0x24b   :  { %1790 = vmatpush1.bf16.msra.mxu1 %v3559_v20  ;;  %1913 = vmatpush1.bf16.msra.mxu0 %v3565_v21  ;;  %v3564_v20 = vcombine.high %v927_v6, %v935_v8  ;;  %v3570_v21 = vcombine.high %v930_v9, %v938_v10  ;;  %v4275_v6 = vld [vmem:[%s5707_s6 + $0x48] sm:$0xff]   ;;  %v3552_v8 = vcombine.high %v913_v62, %v921_v63 }
 0x24c   :  { %1791 = vmatprep.subr.bf16.mxu1 %v3576_v24  ;;  %1914 = vmatprep.subr.bf16.mxu0 %v3582_v25  ;;  %v959_v24 = vld [vmem:[%s5706_s4 + $0x218] sm:$0xff]  ;;  %v4276_v9 = vld [vmem:[%s5707_s6 + $0x8] sm:$0xff]   ;;  %v3551_v10 = vcombine.low %v913_v62, %v921_v63 }
 0x24d   :  { %v967_v25 = vld [vmem:[%s5706_s4 + $0x258] sm:$0xff] }
 0x24e   :  { %v3595_v18 = vcombine.low %v959_v24, %v967_v25 }
 0x24f   :  { %1792 = vmatpush1.bf16.msra.mxu1 %v3575_v14  ;;  %1915 = vmatpush1.bf16.msra.mxu0 %v3581_v30  ;;  %v3580_v14 = vcombine.high %v943_v15, %v951_v16  ;;  %v3586_v30 = vcombine.high %v946_v17, %v954_v19  ;;  %v4278_v15 = vld [vmem:[%s5707_s6 + $0x10] sm:$0xff]   ;;  %v961_v17 = vld [vmem:[%s5706_s4 + $0x228] sm:$0xff] }
 0x250   :  { %1793 = vmatprep.subr.bf16.mxu1 %v3592_v33  ;;  %1916 = vmatprep.subr.bf16.mxu0 %v3598_v34  ;;  %v975_v33 = vld [vmem:[%s5706_s4 + $0x298] sm:$0xff]  ;;  %v969_v19 = vld [vmem:[%s5706_s4 + $0x268] sm:$0xff] }
 0x251   :  { %v983_v34 = vld [vmem:[%s5706_s4 + $0x2d8] sm:$0xff] }
 0x252   :  { %v3611_v47 = vcombine.low %v975_v33, %v983_v34 }
 0x253   :  { %1794 = vmatpush1.bf16.msra.mxu1 %v3591_v37  ;;  %1917 = vmatpush1.bf16.msra.mxu0 %v3597_v38  ;;  %v3596_v37 = vcombine.high %v959_v24, %v967_v25  ;;  %v3602_v38 = vcombine.high %v962_v26, %v970_v28  ;;  %v977_v24 = vld [vmem:[%s5706_s4 + $0x2a8] sm:$0xff]  ;;  %v4281_v26 = vld [vmem:[%s5707_s6 + $0x60] sm:$0xff]   ;;  %v3600_v28 = vcombine.high %v961_v17, %v969_v19 }
 0x254   :  { %1795 = vmatprep.subr.bf16.mxu1 %v3608_v29  ;;  %1918 = vmatprep.subr.bf16.mxu0 %v3614_v44  ;;  %v994_v29 = vld [vmem:[%s5706_s4 + $0x330] sm:$0xff]  ;;  %v985_v25 = vld [vmem:[%s5706_s4 + $0x2e8] sm:$0xff] }
 0x255   :  { %v1002_v44 = vld [vmem:[%s5706_s4 + $0x370] sm:$0xff] }
 0x256   :  { %v3633_v43 = vcombine.low %v994_v29, %v1002_v44 }
 0x257   :  { %1796 = vmatpush1.bf16.msra.mxu1 %v3607_v45  ;;  %1919 = vmatpush1.bf16.msra.mxu0 %v3613_v27  ;;  %v3612_v45 = vcombine.high %v975_v33, %v983_v34  ;;  %v3618_v27 = vcombine.high %v978_v35, %v986_v11  ;;  %v4283_v33 = vld [vmem:[%s5707_s6 + $0x68] sm:$0xff]   ;;  %v3616_v34 = vcombine.high %v977_v24, %v985_v25 }
 0x258   :  { %1797 = vmatprep.subr.bf16.mxu1 %v3624_v51  ;;  %1920 = vmatprep.subr.bf16.mxu0 %v3630_v52  ;;  %v1010_v51 = vld [vmem:[%s5706_s4 + $0x3b0] sm:$0xff]  ;;  %v3615_v35 = vcombine.low %v977_v24, %v985_v25  ;;  %v1009_v11 = vld [vmem:[%s5706_s4 + $0x3a8] sm:$0xff]  ;;  %v4307_v24 = vld [vmem:[%s5707_s6 + $0xa0] sm:$0xff]  }
 0x259   :  { %v1018_v52 = vld [vmem:[%s5706_s4 + $0x3f0] sm:$0xff]  ;;  %v4309_v25 = vld [vmem:[%s5707_s6 + $0xe8] sm:$0xff]  }
 0x25a   :  { %v3649_v61 = vcombine.low %v1010_v51, %v1018_v52 }
 0x25b   :  { %1798 = vmatpush1.bf16.msra.mxu1 %v3623_v39  ;;  %1921 = vmatpush1.bf16.msra.mxu0 %v3629_v54  ;;  %v3628_v39 = vcombine.high %v991_v41, %v999_v42  ;;  %v3634_v54 = vcombine.high %v994_v29, %v1002_v44  ;;  %v899_v42 = vld [vmem:[%s5706_s4 + $0x38] sm:$0xff] }
 0x25c   :  { %1799 = vmatprep.subr.bf16.mxu1 %v3640_v57  ;;  %1922 = vmatprep.subr.bf16.mxu0 %v3646_v58  ;;  %v3644_v57 = vcombine.high %v1007_v49, %v1015_v36  ;;  %v3650_v58 = vcombine.high %v1010_v51, %v1018_v52  ;;  %v907_v29 = vld [vmem:[%s5706_s4 + $0x78] sm:$0xff]  ;;  %v4290_v52 = vld [vmem:[%s5707_s6 + $0x140] sm:$0xff]  }
 0x25d   :  { %v923_v51 = vld [vmem:[%s5706_s4 + $0xf8] sm:$0xff] }
 0x25f   :  { %1800 = vmatpush1.bf16.msra.mxu1 %v3639_v59  ;;  %1923 = vmatpush1.bf16.msra.mxu0 %v3645_v46  ;;  %v4273_v59 = vld [vmem:[%s5707_s6 + $0x40] sm:$0xff]   ;;  %v3643_v46 = vcombine.low %v1007_v49, %v1015_v36  ;;  %v915_v49 = vld [vmem:[%s5706_s4 + $0xb8] sm:$0xff] }
 0x260   :  { %1867 = vmatprep.subr.bf16.mxu1 %v3532_v1  ;;  %1990 = vmatprep.subr.bf16.mxu0 %v3538_v2  ;;  %v4274_v1 = vld [vmem:[%s5707_s6] sm:$0xff]   ;;  %v3535_v2 = vcombine.low %v897_v56, %v905_v7  ;;  %v4288_v36 = vld [vmem:[%s5707_s6 + $0x38] sm:$0xff]   ;;  %v3555_v56 = vcombine.low %v915_v49, %v923_v51 }
 0x262   :  { %1818 = vmatmul.mubr.bf16.vlgmr.msra.gmra.mrb[8].mxu1 %v4966_v53  ;;  %1941 = vmatmul.mubr.bf16.vlgmr.msra.gmra.mrb[68].mxu0 %v4966_v53 }
 0x263   :  { %1868 = vmatpush1.bf16.msra.mxu1 %v3531_v4  ;;  %1991 = vmatpush1.bf16.msra.mxu0 %v3537_v5  ;;  %v929_v4 = vld [vmem:[%s5706_s4 + $0x128] sm:$0xff] }
 0x264   :  { %1869 = vmatprep.subr.bf16.mxu1 %v3548_v60  ;;  %1992 = vmatprep.subr.bf16.mxu0 %v3554_v12  ;;  %v937_v5 = vld [vmem:[%s5706_s4 + $0x168] sm:$0xff] }
 0x265   :  { %1899 = vmatprep.mubr.bf16.mxu1 %v4401_v50  ;;  %2022 = vmatprep.mubr.bf16.mxu0 %v4401_v50  ;;  %v945_v60 = vld [vmem:[%s5706_s4 + $0x1a8] sm:$0xff]  ;;  %v3567_v16 = vcombine.low %v929_v4, %v937_v5 }
 0x266   :  { %v953_v12 = vld [vmem:[%s5706_s4 + $0x1e8] sm:$0xff] }
 0x267   :  { %1870 = vmatpush1.bf16.msra.mxu1 %v3547_v13  ;;  %1993 = vmatpush1.bf16.msra.mxu0 %v3553_v3  ;;  %v4277_v13 = vld [vmem:[%s5707_s6 + $0x50] sm:$0xff]   ;;  %v3568_v3 = vcombine.high %v929_v4, %v937_v5  ;;  %v995_v5 = vld [vmem:[%s5706_s4 + $0x338] sm:$0xff] }
 0x268   :  { %1871 = vmatprep.subr.bf16.mxu1 %v3564_v20  ;;  %1994 = vmatprep.subr.bf16.mxu0 %v3570_v21  ;;  %v4279_v20 = vld [vmem:[%s5707_s6 + $0x58] sm:$0xff]   ;;  %v3584_v21 = vcombine.high %v945_v60, %v953_v12 }
 0x26b   :  { %1872 = vmatpush1.bf16.msra.mxu1 %v3563_v22  ;;  %1995 = vmatpush1.bf16.msra.mxu0 %v3569_v23  ;;  %v4280_v22 = vld [vmem:[%s5707_s6 + $0x18] sm:$0xff]   ;;  %v3583_v23 = vcombine.low %v945_v60, %v953_v12 }
 0x26c   :  { %1873 = vmatprep.subr.bf16.mxu1 %v3580_v14  ;;  %1996 = vmatprep.subr.bf16.mxu0 %v3586_v30  ;;  %v4282_v14 = vld [vmem:[%s5707_s6 + $0x20] sm:$0xff]   ;;  %v3599_v30 = vcombine.low %v961_v17, %v969_v19  ;;  %v1019_v60 = vld [vmem:[%s5706_s4 + $0x3f8] sm:$0xff]  ;;  %v4293_v17 = vld [vmem:[%s5707_s6 + $0xc8] sm:$0xff]  }
 0x26d   :  { %v4295_v19 = vld [vmem:[%s5707_s6 + $0x88] sm:$0xff]  }
 0x26f   :  { %1874 = vmatpush1.bf16.msra.mxu1 %v3579_v31  ;;  %1997 = vmatpush1.bf16.msra.mxu0 %v3585_v32  ;;  %v993_v31 = vld [vmem:[%s5706_s4 + $0x328] sm:$0xff] }
 0x270   :  { %1875 = vmatprep.subr.bf16.mxu1 %v3596_v37  ;;  %1998 = vmatprep.subr.bf16.mxu0 %v3602_v38  ;;  %v1001_v32 = vld [vmem:[%s5706_s4 + $0x368] sm:$0xff] }
 0x271   :  { %v3632_v37 = vcombine.high %v993_v31, %v1001_v32  ;;  %v1017_v38 = vld [vmem:[%s5706_s4 + $0x3e8] sm:$0xff]  ;;  %v3631_v41 = vcombine.low %v993_v31, %v1001_v32  ;;  %v4319_v31 = vld [vmem:[%s5707_s6 + $0xb8] sm:$0xff]   ;;  %v4321_v32 = vld [vmem:[%s5707_s6 + $0x1c0] sm:$0xff]  }
 0x272   :  { %v3648_v44 = vcombine.high %v1009_v11, %v1017_v38 }
 0x273   :  { %1876 = vmatpush1.bf16.msra.mxu1 %v3595_v18  ;;  %1999 = vmatpush1.bf16.msra.mxu0 %v3601_v40  ;;  %v4284_v18 = vld [vmem:[%s5707_s6 + $0x28] sm:$0xff]   ;;  %v4285_v40 = vld [vmem:[%s5707_s6 + $0x70] sm:$0xff]  }
 0x274   :  { %1877 = vmatprep.subr.bf16.mxu1 %v3612_v45  ;;  %2000 = vmatprep.subr.bf16.mxu0 %v3618_v27  ;;  %v4286_v45 = vld [vmem:[%s5707_s6 + $0x30] sm:$0xff]   ;;  %v4287_v27 = vld [vmem:[%s5707_s6 + $0x78] sm:$0xff]  }
 0x277   :  { %1878 = vmatpush1.bf16.msra.mxu1 %v3611_v47  ;;  %2001 = vmatpush1.bf16.msra.mxu0 %v3617_v48  ;;  %v3647_v47 = vcombine.low %v1009_v11, %v1017_v38  ;;  %v3540_v48 = vcombine.high %v899_v42, %v907_v29  ;;  %v5354_v11 = vld [vmem:[%s5708_s5] sm:$0xff] }
 0x278   :  { %1879 = vmatprep.subr.bf16.mxu1 %v3628_v39  ;;  %2002 = vmatprep.subr.bf16.mxu0 %v3634_v54  ;;  %v3539_v39 = vcombine.low %v899_v42, %v907_v29  ;;  %v3556_v54 = vcombine.high %v915_v49, %v923_v51 }
 0x27b   :  { %1880 = vmatpush1.bf16.msra.mxu1 %v3627_v55  ;;  %2003 = vmatpush1.bf16.msra.mxu0 %v3633_v43  ;;  %v931_v55 = vld [vmem:[%s5706_s4 + $0x138] sm:$0xff] }
 0x27c   :  { %1881 = vmatprep.subr.bf16.mxu1 %v3644_v57  ;;  %2004 = vmatprep.subr.bf16.mxu0 %v3650_v58  ;;  %v939_v43 = vld [vmem:[%s5706_s4 + $0x178] sm:$0xff] }
 0x27d   :  { %v3572_v7 = vcombine.high %v931_v55, %v939_v43  ;;  %v947_v57 = vld [vmem:[%s5706_s4 + $0x1b8] sm:$0xff] }
 0x27e   :  { %v955_v58 = vld [vmem:[%s5706_s4 + $0x1f8] sm:$0xff] }
 0x27f   :  { %1882 = vmatpush1.bf16.msra.mxu1 %v3643_v46  ;;  %2005 = vmatpush1.bf16.msra.mxu0 %v3649_v61  ;;  %v3588_v46 = vcombine.high %v947_v57, %v955_v58  ;;  %v963_v61 = vld [vmem:[%s5706_s4 + $0x238] sm:$0xff]  ;;  %v3587_v62 = vcombine.low %v947_v57, %v955_v58  ;;  %v4294_v57 = vld [vmem:[%s5707_s6 + $0x148] sm:$0xff]  }
 0x280   :  { %1949 = vmatprep.subr.bf16.mxu1 %v3536_v0  ;;  %3920 = vmatprep.subr.bf16.mxu0 %v4273_v59  ;;  %v3571_v59 = vcombine.low %v931_v55, %v939_v43  ;;  %v979_v0 = vld [vmem:[%s5706_s4 + $0x2b8] sm:$0xff] }
 0x282   :  { %1900 = vmatmul.mubr.bf16.vlgmr.msra.gmra.mrb[12].mxu1 %v4966_v53  ;;  %2023 = vmatmul.mubr.bf16.vlgmr.msra.gmra.mrb[72].mxu0 %v4966_v53 }
 0x283   :  { %1950 = vmatpush1.bf16.msra.mxu1 %v3535_v2  ;;  %1981 = vmatprep.mubr.bf16.mxu1 %v4401_v50 }
 0x284   :  { %1951 = vmatprep.subr.bf16.mxu1 %v3552_v8  ;;  %3921 = vmatpush3.bf16.msra.mxu0 %v4274_v1  ;;  %v987_v1 = vld [vmem:[%s5706_s4 + $0x2f8] sm:$0xff] }
 0x285   :  { %3922 = vmatprep.subr.bf16.mxu0 %v4275_v6  ;;  %v3620_v4 = vcombine.high %v979_v0, %v987_v1  ;;  %v1003_v6 = vld [vmem:[%s5706_s4 + $0x378] sm:$0xff]  ;;  %v3619_v8 = vcombine.low %v979_v0, %v987_v1  ;;  %v4308_v0 = vld [vmem:[%s5707_s6 + $0x120] sm:$0xff]  }
 0x286   :  { %v3635_v12 = vcombine.low %v995_v5, %v1003_v6 }
 0x287   :  { %1952 = vmatpush1.bf16.msra.mxu1 %v3551_v10  ;;  %v1011_v10 = vld [vmem:[%s5706_s4 + $0x3b8] sm:$0xff] }
 0x288   :  { %1953 = vmatprep.subr.bf16.mxu1 %v3568_v3  ;;  %3923 = vmatpush3.bf16.msra.mxu0 %v4276_v9  ;;  %v3636_v9 = vcombine.high %v995_v5, %v1003_v6  ;;  %v3651_v3 = vcombine.low %v1011_v10, %v1019_v60  ;;  %v4312_v5 = vld [vmem:[%s5707_s6 + $0x128] sm:$0xff]  }
 0x289   :  { %3924 = vmatprep.subr.bf16.mxu0 %v4277_v13  ;;  %v3652_v13 = vcombine.high %v1011_v10, %v1019_v60  ;;  %v5401_v6 = vld [vmem:[%s5708_s5 + $0x8] sm:$0xff]  ;;  %v4314_v10 = vld [vmem:[%s5707_s6 + $0x170] sm:$0xff]  }
 0x28b   :  { %1954 = vmatpush1.bf16.msra.mxu1 %v3567_v16  ;;  %v4291_v16 = vld [vmem:[%s5707_s6 + $0x80] sm:$0xff]  }
 0x28c   :  { %1955 = vmatprep.subr.bf16.mxu1 %v3584_v21  ;;  %3925 = vmatpush3.bf16.msra.mxu0 %v4278_v15  ;;  %v4289_v15 = vld [vmem:[%s5707_s6 + $0xc0] sm:$0xff]   ;;  %v4299_v21 = vld [vmem:[%s5707_s6 + $0x90] sm:$0xff]  }
 0x28d   :  { %3926 = vmatprep.subr.bf16.mxu0 %v4279_v20  ;;  %v4297_v20 = vld [vmem:[%s5707_s6 + $0xd0] sm:$0xff]  }
 0x28f   :  { %1956 = vmatpush1.bf16.msra.mxu1 %v3583_v23  ;;  %v4305_v23 = vld [vmem:[%s5707_s6 + $0xe0] sm:$0xff]  }
 0x290   :  { %1957 = vmatprep.subr.bf16.mxu1 %v3600_v28  ;;  %3927 = vmatpush3.bf16.msra.mxu0 %v4280_v22  ;;  %v4303_v22 = vld [vmem:[%s5707_s6 + $0x98] sm:$0xff]   ;;  %v4313_v28 = vld [vmem:[%s5707_s6 + $0xf0] sm:$0xff]  }
 0x291   :  { %3928 = vmatprep.subr.bf16.mxu0 %v4281_v26  ;;  %v4311_v26 = vld [vmem:[%s5707_s6 + $0xa8] sm:$0xff]  }
 0x293   :  { %1958 = vmatpush1.bf16.msra.mxu1 %v3599_v30  ;;  %v4317_v30 = vld [vmem:[%s5707_s6 + $0xf8] sm:$0xff]  }
 0x294   :  { %1959 = vmatprep.subr.bf16.mxu1 %v3616_v34  ;;  %3929 = vmatpush3.bf16.msra.mxu0 %v4282_v14  ;;  %v4315_v14 = vld [vmem:[%s5707_s6 + $0xb0] sm:$0xff]  }
 0x295   :  { %3930 = vmatprep.subr.bf16.mxu0 %v4283_v33  ;;  %v1024_v33 = vlaneseq }
 0x297   :  { %1960 = vmatpush1.bf16.msra.mxu1 %v3615_v35  ;;  %v5348_v34 = vshrl.u32 %v1024_v33, 7 }
 0x298   :  { %1961 = vmatprep.subr.bf16.mxu1 %v3632_v37  ;;  %3931 = vmatpush3.bf16.msra.mxu0 %v4284_v18 }
 0x299   :  { %3932 = vmatprep.subr.bf16.mxu0 %v4285_v40  ;;  %v1026_v35 = vsub.s32 0, %v5348_v34  ;;  %v1030_v37 = vsub.s32 1, %v5348_v34  ;;  %v1046_v38 = vsub.s32 5, %v5348_v34  ;;  %v1042_v1 = vsub.s32 4, %v5348_v34 }
 0x29b   :  { %1962 = vmatpush1.bf16.msra.mxu1 %v3631_v41  ;;  %v1027_v18 = vrot.slane %v5354_v11, %v1026_v35  ;;  %v1031_v40 = vrot.slane %v5354_v11, %v1030_v37  ;;  %v1047_v41 = vrot.slane %v5354_v11, %v1046_v38 }
 0x29c   :  { %1963 = vmatprep.subr.bf16.mxu1 %v3648_v44  ;;  %3933 = vmatpush3.bf16.msra.mxu0 %v4286_v45 }
 0x29d   :  { %3934 = vmatprep.subr.bf16.mxu0 %v4287_v27 }
 0x29f   :  { %1964 = vmatpush1.bf16.msra.mxu1 %v3647_v47 }
 0x2a0   :  { %2031 = vmatprep.subr.bf16.mxu1 %v3540_v48  ;;  %3935 = vmatpush3.bf16.msra.mxu0 %v4288_v36 }
 0x2a1   :  { %3964 = vmatprep.subr.bf16.mxu0 %v4290_v52 }
 0x2a2   :  { %1982 = vmatmul.mubr.bf16.vlgmr.msra.gmra.mrb[16].mxu1 %v4966_v53 }
 0x2a3   :  { %2032 = vmatpush1.bf16.msra.mxu1 %v3539_v39  ;;  %2063 = vmatprep.mubr.bf16.mxu1 %v4401_v50  ;;  %v971_v50 = vld [vmem:[%s5706_s4 + $0x278] sm:$0xff] }
 0x2a4   :  { %2033 = vmatprep.subr.bf16.mxu1 %v3556_v54  ;;  %v3604_v63 = vcombine.high %v963_v61, %v971_v50  ;;  %v3603_v2 = vcombine.low %v963_v61, %v971_v50  ;;  %v4300_v61 = vld [vmem:[%s5707_s6 + $0x110] sm:$0xff]   ;;  %v4302_v50 = vld [vmem:[%s5707_s6 + $0x158] sm:$0xff]  }
 0x2a7   :  { %2034 = vmatpush1.bf16.msra.mxu1 %v3555_v56  ;;  %v4292_v56 = vld [vmem:[%s5707_s6 + $0x100] sm:$0xff]  }
 0x2a8   :  { %2035 = vmatprep.subr.bf16.mxu1 %v3572_v7 }
 0x2ab   :  { %2036 = vmatpush1.bf16.msra.mxu1 %v3571_v59  ;;  %v4296_v59 = vld [vmem:[%s5707_s6 + $0x108] sm:$0xff]  }
 0x2ac   :  { %2037 = vmatprep.subr.bf16.mxu1 %v3588_v46  ;;  %v4298_v46 = vld [vmem:[%s5707_s6 + $0x150] sm:$0xff]  }
 0x2af   :  { %2038 = vmatpush1.bf16.msra.mxu1 %v3587_v62  ;;  %v4304_v62 = vld [vmem:[%s5707_s6 + $0x118] sm:$0xff]  }
 0x2b0   :  { %2039 = vmatprep.subr.bf16.mxu1 %v3604_v63  ;;  %v4306_v63 = vld [vmem:[%s5707_s6 + $0x160] sm:$0xff]  }
 0x2b3   :  { %2040 = vmatpush1.bf16.msra.mxu1 %v3603_v2  ;;  %v4310_v2 = vld [vmem:[%s5707_s6 + $0x168] sm:$0xff]  }
 0x2b4   :  { %2041 = vmatprep.subr.bf16.mxu1 %v3620_v4  ;;  %v1034_v4 = vsub.s32 2, %v5348_v34 }
 0x2b6   :  { %v1035_v60 = vrot.slane %v5354_v11, %v1034_v4 }
 0x2b7   :  { %2042 = vmatpush1.bf16.msra.mxu1 %v3619_v8  ;;  %v1038_v8 = vsub.s32 3, %v5348_v34 }
 0x2b8   :  { %2043 = vmatprep.subr.bf16.mxu1 %v3636_v9  ;;  %v1043_v9 = vrot.slane %v5354_v11, %v1042_v1 }
 0x2bb   :  { %2044 = vmatpush1.bf16.msra.mxu1 %v3635_v12  ;;  %v1059_v12 = vrot.slane %v5401_v6, %v1026_v35  ;;  %v4322_v35 = vld [vmem:[%s5707_s6 + $0x240] sm:$0xff]  }
 0x2bc   :  { %2045 = vmatprep.subr.bf16.mxu1 %v3652_v13  ;;  %v1039_v13 = vrot.slane %v5354_v11, %v1038_v8 }
 0x2bf   :  { %2046 = vmatpush1.bf16.msra.mxu1 %v3651_v3  ;;  %v1063_v3 = vrot.slane %v5401_v6, %v1030_v37 }
 0x2c0   :  { %3942 = vmatprep.subr.bf16.mxu1 %v4289_v15  ;;  %v4316_v15 = vld [vmem:[%s5707_s6 + $0x130] sm:$0xff]  }
 0x2c2   :  { %2064 = vmatmul.mubr.bf16.vlgmr.msra.gmra.mrb[20].mxu1 %v4966_v53  ;;  %v4301_v53 = vld [vmem:[%s5707_s6 + $0xd8] sm:$0xff]  }
 0x2c3   :  { %3943 = vmatpush3.bf16.msra.mxu1 %v4291_v16 }
 0x2c4   :  { %3944 = vmatprep.subr.bf16.mxu1 %v4293_v17  ;;  %v4318_v17 = vld [vmem:[%s5707_s6 + $0x178] sm:$0xff]  }
 0x2c7   :  { %3945 = vmatpush3.bf16.msra.mxu1 %v4295_v19 }
 0x2c8   :  { %3946 = vmatprep.subr.bf16.mxu1 %v4297_v20 }
 0x2cb   :  { %3947 = vmatpush3.bf16.msra.mxu1 %v4299_v21 }
 0x2cc   :  { %3948 = vmatprep.subr.bf16.mxu1 %v4301_v53 }
 0x2cf   :  { %3949 = vmatpush3.bf16.msra.mxu1 %v4303_v22 }
 0x2d0   :  { %3950 = vmatprep.subr.bf16.mxu1 %v4305_v23 }
 0x2d3   :  { %3951 = vmatpush3.bf16.msra.mxu1 %v4307_v24 }
 0x2d4   :  { %3952 = vmatprep.subr.bf16.mxu1 %v4309_v25 }
 0x2d7   :  { %3953 = vmatpush3.bf16.msra.mxu1 %v4311_v26 }
 0x2d8   :  { %3954 = vmatprep.subr.bf16.mxu1 %v4313_v28 }
 0x2db   :  { %3955 = vmatpush3.bf16.msra.mxu1 %v4315_v14  ;;  %v4320_v14 = vld [vmem:[%s5707_s6 + $0x138] sm:$0xff]  }
 0x2dc   :  { %3956 = vmatprep.subr.bf16.mxu1 %v4317_v30 }
 0x2df   :  { %3957 = vmatpush3.bf16.msra.mxu1 %v4319_v31 }
 0x2e0   :  { %3986 = vmatprep.subr.bf16.mxu1 %v4321_v32 }
 0x315   :  { %v1778_v42 = vpop.f32.mrb[4].mxu1  ;;  %v1860_v29 = vpop.f32.mrb[64].mxu0 }
 0x316   :  { %v1779_v44 = vadd.f32 %v1778_v42, %v1027_v18  ;;  %v1780_v45 = vpop.f32.mrb[5].mxu1  ;;  %v1862_v27 = vpop.f32.mrb[65].mxu0  ;;  %v1861_v16 = vadd.f32 %v1860_v29, %v1043_v9  ;;  %v4324_v42 = vld [vmem:[%s5707_s6 + $0x200] sm:$0xff]  }
 0x317   :  { %v1781_v47 = vadd.f32 %v1780_v45, %v1031_v40  ;;  %v1863_v48 = vadd.f32 %v1862_v27, %v1047_v41  ;;  %v1782_v49 = vpop.f32.mrb[6].mxu1  ;;  %v1864_v36 = vpop.f32.mrb[66].mxu0  ;;  %v4323_v41 = vld [vmem:[%s5707_s6 + $0x180] sm:$0xff]   ;;  %v4325_v45 = vld [vmem:[%s5707_s6 + $0x1c8] sm:$0xff]  }
 0x318   :  { %v2072_v51 = vmax.f32 %v1779_v44, 0.0  ;;  %v1783_v52 = vpop.f32.mrb[7].mxu1  ;;  %v1865_v39 = vpop.f32.mrb[67].mxu0  ;;  %v2076_v30 = vmax.f32 %v1861_v16, 0.0  ;;  %v4326_v27 = vld [vmem:[%s5707_s6 + $0x248] sm:$0xff]   ;;  %v4329_v36 = vld [vmem:[%s5707_s6 + $0x1d0] sm:$0xff]  }
 0x319   :  { %v2073_v54 = vmax.f32 %v1781_v47, 0.0  ;;  %v2077_v55 = vmax.f32 %v1863_v48, 0.0  ;;  %v4327_v48 = vld [vmem:[%s5707_s6 + $0x188] sm:$0xff]   ;;  %v4331_v52 = vld [vmem:[%s5707_s6 + $0x190] sm:$0xff]  }
 0x31a   :  { %v2088_v7 = vpack.c.bf16 %v2072_v51, %v2072_v51  ;;  %v2092_v29 = vpack.c.bf16 %v2076_v30, %v2076_v30  ;;  %v4328_v49 = vld [vmem:[%s5707_s6 + $0x208] sm:$0xff]   ;;  %v4330_v51 = vld [vmem:[%s5707_s6 + $0x250] sm:$0xff]  }
 0x31b   :  { %v2089_v43 = vpack.c.bf16 %v2073_v54, %v2073_v54  ;;  %v2093_v58 = vpack.c.bf16 %v2077_v55, %v2077_v55  ;;  %v4332_v39 = vld [vmem:[%s5707_s6 + $0x210] sm:$0xff]   ;;  %v4333_v54 = vld [vmem:[%s5707_s6 + $0x1d8] sm:$0xff]  }
 0x31c   :  { %v4334_v55 = vld [vmem:[%s5707_s6 + $0x258] sm:$0xff]  }
 0x31d   :  { %3167 = vmatprep.mubr.bf16.mxu0 %v2089_v43  ;;  %v4335_v43 = vld [vmem:[%s5707_s6 + $0x198] sm:$0xff]  }
 0x31e   :  { %3168 = vmatmul.mubr.bf16.vlgmr.msra.gmra.mrb[76].mxu0 %v2088_v7  ;;  %v4337_v7 = vld [vmem:[%s5707_s6 + $0x1e0] sm:$0xff]  }
 0x31f   :  { %3965 = vmatpush3.bf16.msra.mxu0 %v4292_v56  ;;  %3247 = vmatprep.mubr.bf16.mxu0 %v2093_v58  ;;  %v4336_v56 = vld [vmem:[%s5707_s6 + $0x218] sm:$0xff]   ;;  %v4339_v58 = vld [vmem:[%s5707_s6 + $0x1a0] sm:$0xff]  }
 0x320   :  { %3966 = vmatprep.subr.bf16.mxu0 %v4294_v57  ;;  %v4338_v57 = vld [vmem:[%s5707_s6 + $0x260] sm:$0xff]  }
 0x323   :  { %3967 = vmatpush3.bf16.msra.mxu0 %v4296_v59  ;;  %v4340_v59 = vld [vmem:[%s5707_s6 + $0x220] sm:$0xff]  }
 0x324   :  { %3968 = vmatprep.subr.bf16.mxu0 %v4298_v46  ;;  %v4341_v46 = vld [vmem:[%s5707_s6 + $0x1e8] sm:$0xff]  }
 0x327   :  { %3969 = vmatpush3.bf16.msra.mxu0 %v4300_v61  ;;  %v4342_v61 = vld [vmem:[%s5707_s6 + $0x268] sm:$0xff]  }
 0x328   :  { %3970 = vmatprep.subr.bf16.mxu0 %v4302_v50  ;;  %v1050_v50 = vsub.s32 6, %v5348_v34 }
 0x32a   :  { %v1051_v9 = vrot.slane %v5354_v11, %v1050_v50 }
 0x32b   :  { %3971 = vmatpush3.bf16.msra.mxu0 %v4304_v62  ;;  %v4343_v62 = vld [vmem:[%s5707_s6 + $0x1a8] sm:$0xff]  }
 0x32c   :  { %3972 = vmatprep.subr.bf16.mxu0 %v4306_v63  ;;  %v4344_v63 = vld [vmem:[%s5707_s6 + $0x228] sm:$0xff]  }
 0x32f   :  { %3973 = vmatpush3.bf16.msra.mxu0 %v4308_v0  ;;  %v1054_v0 = vsub.s32 7, %v5348_v34  ;;  %v4400_v34 = vld [vmem:[%s5707_s6 + $0x3b8] sm:$0xff]  }
 0x330   :  { %3974 = vmatprep.subr.bf16.mxu0 %v4310_v2  ;;  %v4345_v2 = vld [vmem:[%s5707_s6 + $0x1f0] sm:$0xff]  }
 0x333   :  { %3975 = vmatpush3.bf16.msra.mxu0 %v4312_v5  ;;  %v4346_v5 = vld [vmem:[%s5707_s6 + $0x270] sm:$0xff]  }
 0x334   :  { %3976 = vmatprep.subr.bf16.mxu0 %v4314_v10  ;;  %v1075_v10 = vrot.slane %v5401_v6, %v1042_v1  ;;  %v4349_v1 = vld [vmem:[%s5707_s6 + $0x1f8] sm:$0xff]  }
 0x335   :  { %v1819_v19 = vpop.f32.mrb[8].mxu1  ;;  %v1942_v20 = vpop.f32.mrb[68].mxu0 }
 0x336   :  { %v1820_v21 = vadd.f32 %v1819_v19, %v1035_v60  ;;  %v5424_v53 = vadd.f32 %v1942_v20, %v1059_v12  ;;  %v1821_v22 = vpop.f32.mrb[9].mxu1  ;;  %v1944_v23 = vpop.f32.mrb[69].mxu0  ;;  %v1055_v60 = vrot.slane %v5354_v11, %v1054_v0  ;;  %v1079_v12 = vrot.slane %v5401_v6, %v1046_v38  ;;  %v4350_v11 = vld [vmem:[%s5707_s6 + $0x278] sm:$0xff]  }
 0x337   :  { %v1822_v24 = vadd.f32 %v1821_v22, %v1039_v13  ;;  %v1945_v25 = vadd.f32 %v1944_v23, %v1063_v3  ;;  %v1823_v26 = vpop.f32.mrb[10].mxu1  ;;  %v1946_v28 = vpop.f32.mrb[70].mxu0  ;;  %3977 = vmatpush3.bf16.msra.mxu0 %v4316_v15  ;;  %v4347_v13 = vld [vmem:[%s5707_s6 + $0x1b0] sm:$0xff]  }
 0x338   :  { %v2074_v31 = vmax.f32 %v1820_v21, 0.0  ;;  %v1824_v32 = vpop.f32.mrb[11].mxu1  ;;  %v1947_v33 = vpop.f32.mrb[71].mxu0  ;;  %3978 = vmatprep.subr.bf16.mxu0 %v4318_v17  ;;  %v4348_v3 = vld [vmem:[%s5707_s6 + $0x230] sm:$0xff]   ;;  %v4352_v26 = vld [vmem:[%s5707_s6 + $0x238] sm:$0xff]   ;;  %v2080_v28 = vmax.f32 %v5424_v53, 0.0 }
 0x339   :  { %v2075_v37 = vmax.f32 %v1822_v24, 0.0  ;;  %v2081_v18 = vmax.f32 %v1945_v25, 0.0  ;;  %v4351_v25 = vld [vmem:[%s5707_s6 + $0x1b8] sm:$0xff]   ;;  %v4353_v32 = vld [vmem:[%s5707_s6 + $0x2c0] sm:$0xff]  }
 0x33a   :  { %v2090_v44 = vpack.c.bf16 %v2074_v31, %v2074_v31  ;;  %v4354_v33 = vld [vmem:[%s5707_s6 + $0x340] sm:$0xff]  }
 0x33b   :  { %v2091_v40 = vpack.c.bf16 %v2075_v37, %v2075_v37  ;;  %3979 = vmatpush3.bf16.msra.mxu0 %v4320_v14  ;;  %v2097_v47 = vpack.c.bf16 %v2081_v18, %v2081_v18  ;;  %v4355_v53 = vld [vmem:[%s5707_s6 + $0x280] sm:$0xff]  }
 0x33c   :  { %4008 = vmatprep.subr.bf16.mxu0 %v4322_v35 }
 0x33d   :  { %3207 = vmatprep.mubr.bf16.mxu1 %v2091_v40  ;;  %v4356_v40 = vld [vmem:[%s5707_s6 + $0x300] sm:$0xff]  }
 0x33e   :  { %3208 = vmatmul.mubr.bf16.vlgmr.msra.gmra.mrb[24].mxu1 %v2090_v44  ;;  %3248 = vmatmul.mubr.bf16.vlgmr.msra.gmra.mrb[80].mxu0 %v2092_v29  ;;  %v4357_v29 = vld [vmem:[%s5707_s6 + $0x2c8] sm:$0xff]  }
 0x33f   :  { %3987 = vmatpush3.bf16.msra.mxu1 %v4323_v41  ;;  %4009 = vmatpush3.bf16.msra.mxu0 %v4324_v42  ;;  %v2096_v41 = vpack.c.bf16 %v2080_v28, %v2080_v28  ;;  %v4358_v44 = vld [vmem:[%s5707_s6 + $0x348] sm:$0xff]   ;;  %v4389_v28 = vld [vmem:[%s5707_s6 + $0x3d0] sm:$0xff]  }
 0x340   :  { %3327 = vmatprep.mubr.bf16.mxu0 %v2097_v47  ;;  %3988 = vmatprep.subr.bf16.mxu1 %v4325_v45  ;;  %v4360_v47 = vld [vmem:[%s5707_s6 + $0x308] sm:$0xff]  }
 0x341   :  { %4010 = vmatprep.subr.bf16.mxu0 %v4326_v27  ;;  %v4359_v27 = vld [vmem:[%s5707_s6 + $0x288] sm:$0xff]  }
 0x343   :  { %3989 = vmatpush3.bf16.msra.mxu1 %v4327_v48  ;;  %4011 = vmatpush3.bf16.msra.mxu0 %v4328_v49  ;;  %v4361_v48 = vld [vmem:[%s5707_s6 + $0x2d0] sm:$0xff]  }
 0x344   :  { %3990 = vmatprep.subr.bf16.mxu1 %v4329_v36  ;;  %4012 = vmatprep.subr.bf16.mxu0 %v4330_v51  ;;  %v4362_v49 = vld [vmem:[%s5707_s6 + $0x350] sm:$0xff]  }
 0x345   :  { %v4363_v36 = vld [vmem:[%s5707_s6 + $0x290] sm:$0xff]  }
 0x346   :  { %v4364_v51 = vld [vmem:[%s5707_s6 + $0x310] sm:$0xff]  }
 0x347   :  { %3991 = vmatpush3.bf16.msra.mxu1 %v4331_v52  ;;  %4013 = vmatpush3.bf16.msra.mxu0 %v4332_v39  ;;  %v4365_v52 = vld [vmem:[%s5707_s6 + $0x2d8] sm:$0xff]  }
 0x348   :  { %3992 = vmatprep.subr.bf16.mxu1 %v4333_v54  ;;  %4014 = vmatprep.subr.bf16.mxu0 %v4334_v55  ;;  %v4366_v39 = vld [vmem:[%s5707_s6 + $0x358] sm:$0xff]  }
 0x349   :  { %v4367_v54 = vld [vmem:[%s5707_s6 + $0x298] sm:$0xff]  }
 0x34a   :  { %v4368_v55 = vld [vmem:[%s5707_s6 + $0x318] sm:$0xff]  }
 0x34b   :  { %3993 = vmatpush3.bf16.msra.mxu1 %v4335_v43  ;;  %4015 = vmatpush3.bf16.msra.mxu0 %v4336_v56  ;;  %v4369_v43 = vld [vmem:[%s5707_s6 + $0x2e0] sm:$0xff]  }
 0x34c   :  { %3994 = vmatprep.subr.bf16.mxu1 %v4337_v7  ;;  %4016 = vmatprep.subr.bf16.mxu0 %v4338_v57  ;;  %v4370_v56 = vld [vmem:[%s5707_s6 + $0x360] sm:$0xff]  }
 0x34d   :  { %v4371_v7 = vld [vmem:[%s5707_s6 + $0x2a0] sm:$0xff]  }
 0x34e   :  { %v4372_v57 = vld [vmem:[%s5707_s6 + $0x320] sm:$0xff]  }
 0x34f   :  { %3995 = vmatpush3.bf16.msra.mxu1 %v4339_v58  ;;  %4017 = vmatpush3.bf16.msra.mxu0 %v4340_v59  ;;  %v4373_v58 = vld [vmem:[%s5707_s6 + $0x2e8] sm:$0xff]  }
 0x350   :  { %3996 = vmatprep.subr.bf16.mxu1 %v4341_v46  ;;  %4018 = vmatprep.subr.bf16.mxu0 %v4342_v61  ;;  %v4374_v59 = vld [vmem:[%s5707_s6 + $0x368] sm:$0xff]  }
 0x351   :  { %v4375_v46 = vld [vmem:[%s5707_s6 + $0x2a8] sm:$0xff]  }
 0x352   :  { %v4376_v61 = vld [vmem:[%s5707_s6 + $0x328] sm:$0xff]  }
 0x353   :  { %3997 = vmatpush3.bf16.msra.mxu1 %v4343_v62  ;;  %4019 = vmatpush3.bf16.msra.mxu0 %v4344_v63  ;;  %v4377_v62 = vld [vmem:[%s5707_s6 + $0x2f0] sm:$0xff]  }
 0x354   :  { %3998 = vmatprep.subr.bf16.mxu1 %v4345_v2  ;;  %4020 = vmatprep.subr.bf16.mxu0 %v4346_v5  ;;  %v4378_v63 = vld [vmem:[%s5707_s6 + $0x370] sm:$0xff]   ;;  %v1067_v2 = vrot.slane %v5401_v6, %v1034_v4  ;;  %v1071_v5 = vrot.slane %v5401_v6, %v1038_v8  ;;  %v4381_v4 = vld [vmem:[%s5707_s6 + $0x2f8] sm:$0xff]  }
 0x355   :  { %v1901_v15 = vpop.f32.mrb[12].mxu1  ;;  %v2024_v38 = vpop.f32.mrb[72].mxu0 }
 0x356   :  { %v1902_v16 = vadd.f32 %v1901_v15, %v1051_v9  ;;  %v5530_v17 = vadd.f32 %v2024_v38, %v1075_v10  ;;  %v1903_v19 = vpop.f32.mrb[13].mxu1  ;;  %v2026_v20 = vpop.f32.mrb[73].mxu0  ;;  %v4379_v9 = vld [vmem:[%s5707_s6 + $0x2b0] sm:$0xff]   ;;  %v4384_v15 = vld [vmem:[%s5707_s6 + $0x338] sm:$0xff]  }
 0x357   :  { %v1904_v21 = vadd.f32 %v1903_v19, %v1055_v60  ;;  %v2027_v22 = vadd.f32 %v2026_v20, %v1079_v12  ;;  %v1905_v23 = vpop.f32.mrb[14].mxu1  ;;  %v2028_v24 = vpop.f32.mrb[74].mxu0  ;;  %3999 = vmatpush3.bf16.msra.mxu1 %v4347_v13  ;;  %4021 = vmatpush3.bf16.msra.mxu0 %v4348_v3  ;;  %v4380_v10 = vld [vmem:[%s5707_s6 + $0x330] sm:$0xff]   ;;  %v4382_v60 = vld [vmem:[%s5707_s6 + $0x378] sm:$0xff]   ;;  %v4385_v20 = vld [vmem:[%s5707_s6 + $0x3c0] sm:$0xff]  }
 0x358   :  { %v2078_v14 = vmax.f32 %v1902_v16, 0.0  ;;  %v1906_v30 = vpop.f32.mrb[15].mxu1  ;;  %v2029_v31 = vpop.f32.mrb[75].mxu0  ;;  %4000 = vmatprep.subr.bf16.mxu1 %v4349_v1  ;;  %4022 = vmatprep.subr.bf16.mxu0 %v4350_v11  ;;  %v4383_v11 = vld [vmem:[%s5707_s6 + $0x2b8] sm:$0xff]   ;;  %v2084_v38 = vmax.f32 %v5530_v17, 0.0  ;;  %v4386_v23 = vld [vmem:[%s5707_s6 + $0x380] sm:$0xff]  }
 0x359   :  { %v2079_v35 = vmax.f32 %v1904_v21, 0.0  ;;  %v2085_v37 = vmax.f32 %v2027_v22, 0.0  ;;  %v4387_v17 = vld [vmem:[%s5707_s6 + $0x3c8] sm:$0xff]   ;;  %v4391_v30 = vld [vmem:[%s5707_s6 + $0x3d8] sm:$0xff]  }
 0x35a   :  { %v2094_v42 = vpack.c.bf16 %v2078_v14, %v2078_v14  ;;  %v2100_v24 = vpack.c.bf16 %v2084_v38, %v2084_v38  ;;  %v4390_v14 = vld [vmem:[%s5707_s6 + $0x390] sm:$0xff]   ;;  %v4392_v31 = vld [vmem:[%s5707_s6 + $0x398] sm:$0xff]  }
 0x35b   :  { %v2095_v18 = vpack.c.bf16 %v2079_v35, %v2079_v35  ;;  %4001 = vmatpush3.bf16.msra.mxu1 %v4351_v25  ;;  %4023 = vmatpush3.bf16.msra.mxu0 %v4352_v26  ;;  %v2101_v45 = vpack.c.bf16 %v2085_v37, %v2085_v37  ;;  %v4388_v26 = vld [vmem:[%s5707_s6 + $0x388] sm:$0xff]  }
 0x35c   :  { %4030 = vmatprep.subr.bf16.mxu1 %v4353_v32  ;;  %4052 = vmatprep.subr.bf16.mxu0 %v4354_v33  ;;  %v4393_v32 = vld [vmem:[%s5707_s6 + $0x3e0] sm:$0xff]   ;;  %v4395_v35 = vld [vmem:[%s5707_s6 + $0x3e8] sm:$0xff]  }
 0x35d   :  { %3287 = vmatprep.mubr.bf16.mxu1 %v2095_v18  ;;  %v4394_v33 = vld [vmem:[%s5707_s6 + $0x3a0] sm:$0xff]   ;;  %v4396_v37 = vld [vmem:[%s5707_s6 + $0x3a8] sm:$0xff]   ;;  %v4397_v18 = vld [vmem:[%s5707_s6 + $0x3f0] sm:$0xff]  }
 0x35e   :  { %3288 = vmatmul.mubr.bf16.vlgmr.msra.gmra.mrb[28].mxu1 %v2094_v42  ;;  %3328 = vmatmul.mubr.bf16.vlgmr.msra.gmra.mrb[84].mxu0 %v2096_v41  ;;  %v4398_v41 = vld [vmem:[%s5707_s6 + $0x3b0] sm:$0xff]   ;;  %v4399_v42 = vld [vmem:[%s5707_s6 + $0x3f8] sm:$0xff]  }
 0x35f   :  { %4031 = vmatpush3.bf16.msra.mxu1 %v4355_v53  ;;  %4053 = vmatpush3.bf16.msra.mxu0 %v4356_v40  ;;  %v1083_v53 = vrot.slane %v5401_v6, %v1050_v50  ;;  %v1087_v40 = vrot.slane %v5401_v6, %v1054_v0 }
 0x360   :  { %3407 = vmatprep.mubr.bf16.mxu0 %v2101_v45  ;;  %4032 = vmatprep.subr.bf16.mxu1 %v4357_v29 }
 0x361   :  { %4054 = vmatprep.subr.bf16.mxu0 %v4358_v44 }
 0x363   :  { %4033 = vmatpush3.bf16.msra.mxu1 %v4359_v27  ;;  %4055 = vmatpush3.bf16.msra.mxu0 %v4360_v47 }
 0x364   :  { %4034 = vmatprep.subr.bf16.mxu1 %v4361_v48  ;;  %4056 = vmatprep.subr.bf16.mxu0 %v4362_v49 }
 0x367   :  { %4035 = vmatpush3.bf16.msra.mxu1 %v4363_v36  ;;  %4057 = vmatpush3.bf16.msra.mxu0 %v4364_v51 }
 0x368   :  { %4036 = vmatprep.subr.bf16.mxu1 %v4365_v52  ;;  %4058 = vmatprep.subr.bf16.mxu0 %v4366_v39 }
 0x36b   :  { %4037 = vmatpush3.bf16.msra.mxu1 %v4367_v54  ;;  %4059 = vmatpush3.bf16.msra.mxu0 %v4368_v55  ;;  %v3653_v55 = vld [vmem:[%s5709_s7] ss:$0 sm:$0xff] }
 0x36c   :  { %4038 = vmatprep.subr.bf16.mxu1 %v4369_v43  ;;  %4060 = vmatprep.subr.bf16.mxu0 %v4370_v56 }
 0x36f   :  { %4039 = vmatpush3.bf16.msra.mxu1 %v4371_v7  ;;  %4061 = vmatpush3.bf16.msra.mxu0 %v4372_v57 }
 0x370   :  { %4040 = vmatprep.subr.bf16.mxu1 %v4373_v58  ;;  %4062 = vmatprep.subr.bf16.mxu0 %v4374_v59 }
 0x373   :  { %4041 = vmatpush3.bf16.msra.mxu1 %v4375_v46  ;;  %4063 = vmatpush3.bf16.msra.mxu0 %v4376_v61 }
 0x374   :  { %4042 = vmatprep.subr.bf16.mxu1 %v4377_v62  ;;  %4064 = vmatprep.subr.bf16.mxu0 %v4378_v63 }
 0x375   :  { %v1983_v12 = vpop.f32.mrb[16].mxu1 }
 0x376   :  { %v1984_v8 = vadd.f32 %v1983_v12, %v1067_v2  ;;  %v1985_v13 = vpop.f32.mrb[17].mxu1 }
 0x377   :  { %v1986_v3 = vadd.f32 %v1985_v13, %v1071_v5  ;;  %v1987_v1 = vpop.f32.mrb[18].mxu1  ;;  %4043 = vmatpush3.bf16.msra.mxu1 %v4379_v9  ;;  %4065 = vmatpush3.bf16.msra.mxu0 %v4380_v10 }
 0x378   :  { %v2082_v16 = vmax.f32 %v1984_v8, 0.0  ;;  %v1988_v19 = vpop.f32.mrb[19].mxu1  ;;  %4044 = vmatprep.subr.bf16.mxu1 %v4381_v4  ;;  %4066 = vmatprep.subr.bf16.mxu0 %v4382_v60 }
 0x379   :  { %v2083_v21 = vmax.f32 %v1986_v3, 0.0 }
 0x37a   :  { %v2098_v25 = vpack.c.bf16 %v2082_v16, %v2082_v16 }
 0x37b   :  { %v2099_v22 = vpack.c.bf16 %v2083_v21, %v2083_v21  ;;  %4045 = vmatpush3.bf16.msra.mxu1 %v4383_v11  ;;  %4067 = vmatpush3.bf16.msra.mxu0 %v4384_v15 }
 0x37c   :  { %4074 = vmatprep.subr.bf16.mxu1 %v4385_v20 }
 0x37d   :  { %3367 = vmatprep.mubr.bf16.mxu1 %v2099_v22 }
 0x37e   :  { %3368 = vmatmul.mubr.bf16.vlgmr.msra.gmra.mrb[32].mxu1 %v2098_v25  ;;  %3408 = vmatmul.mubr.bf16.vlgmr.msra.gmra.mrb[88].mxu0 %v2100_v24 }
 0x37f   :  { %4075 = vmatpush3.bf16.msra.mxu1 %v4386_v23 }
 0x380   :  { %4076 = vmatprep.subr.bf16.mxu1 %v4387_v17 }
 0x383   :  { %4077 = vmatpush3.bf16.msra.mxu1 %v4388_v26 }
 0x384   :  { %4078 = vmatprep.subr.bf16.mxu1 %v4389_v28 }
 0x387   :  { %4079 = vmatpush3.bf16.msra.mxu1 %v4390_v14 }
 0x388   :  { %4080 = vmatprep.subr.bf16.mxu1 %v4391_v30 }
 0x38b   :  { %4081 = vmatpush3.bf16.msra.mxu1 %v4392_v31 }
 0x38c   :  { %4082 = vmatprep.subr.bf16.mxu1 %v4393_v32 }
 0x38f   :  { %4083 = vmatpush3.bf16.msra.mxu1 %v4394_v33 }
 0x390   :  { %4084 = vmatprep.subr.bf16.mxu1 %v4395_v35 }
 0x393   :  { %4085 = vmatpush3.bf16.msra.mxu1 %v4396_v37 }
 0x394   :  { %4086 = vmatprep.subr.bf16.mxu1 %v4397_v18 }
 0x395   :  { %v2065_v29 = vpop.f32.mrb[20].mxu1 }
 0x396   :  { %v2066_v44 = vadd.f32 %v2065_v29, %v1083_v53  ;;  %v2067_v45 = vpop.f32.mrb[21].mxu1 }
 0x397   :  { %v2068_v27 = vadd.f32 %v2067_v45, %v1087_v40  ;;  %v2069_v47 = vpop.f32.mrb[22].mxu1  ;;  %4087 = vmatpush3.bf16.msra.mxu1 %v4398_v41 }
 0x398   :  { %v2086_v6 = vmax.f32 %v2066_v44, 0.0  ;;  %v2070_v50 = vpop.f32.mrb[23].mxu1  ;;  %4088 = vmatprep.subr.bf16.mxu1 %v4399_v42 }
 0x399   :  { %v2087_v0 = vmax.f32 %v2068_v27, 0.0 }
 0x39a   :  { %v2102_v49 = vpack.c.bf16 %v2086_v6, %v2086_v6 }
 0x39b   :  { %v2103_v48 = vpack.c.bf16 %v2087_v0, %v2087_v0  ;;  %4089 = vmatpush3.bf16.msra.mxu1 %v4400_v34 }
 0x39d   :  { %3447 = vmatprep.mubr.bf16.mxu1 %v2103_v48 }
 0x39e   :  { %3448 = vmatmul.mubr.bf16.vlgmr.msra.gmra.mrb[36].mxu1 %v2102_v49 }
 0x3f1   :  { %v3936_v36 = vpop.f32.mrb[76].mxu0 }
 0x3f2   :  { %v3937_v51 = vpop.f32.mrb[77].mxu0 }
 0x3f3   :  { %v3938_v52 = vadd.f32 %v3937_v51, %v3936_v36  ;;  %v3939_v39 = vpop.f32.mrb[78].mxu0 }
 0x3f4   :  { %v3940_v54 = vpop.f32.mrb[79].mxu0 }
 0x3f5   :  { %v3170_v58 = vadd.f32 %v3938_v52, %v3653_v55 }
 0x411   :  { %v3958_v43 = vpop.f32.mrb[24].mxu1  ;;  %v3980_v56 = vpop.f32.mrb[80].mxu0 }
 0x412   :  { %v3959_v7 = vpop.f32.mrb[25].mxu1  ;;  %v3981_v57 = vpop.f32.mrb[81].mxu0 }
 0x413   :  { %v3960_v59 = vadd.f32 %v3959_v7, %v3958_v43  ;;  %v3982_v46 = vadd.f32 %v3981_v57, %v3980_v56  ;;  %v3961_v61 = vpop.f32.mrb[26].mxu1  ;;  %v3983_v62 = vpop.f32.mrb[82].mxu0 }
 0x414   :  { %v3962_v63 = vpop.f32.mrb[27].mxu1  ;;  %v3984_v2 = vpop.f32.mrb[83].mxu0 }
 0x415   :  { %v3210_v5 = vadd.f32 %v3960_v59, %v3170_v58 }
 0x417   :  { %v3250_v9 = vadd.f32 %v3982_v46, %v3210_v5 }
 0x431   :  { %v4002_v10 = vpop.f32.mrb[28].mxu1  ;;  %v4024_v4 = vpop.f32.mrb[84].mxu0 }
 0x432   :  { %v4003_v60 = vpop.f32.mrb[29].mxu1  ;;  %v4025_v12 = vpop.f32.mrb[85].mxu0 }
 0x433   :  { %v4004_v8 = vadd.f32 %v4003_v60, %v4002_v10  ;;  %v4026_v13 = vadd.f32 %v4025_v12, %v4024_v4  ;;  %v4005_v3 = vpop.f32.mrb[30].mxu1  ;;  %v4027_v1 = vpop.f32.mrb[86].mxu0 }
 0x434   :  { %v4006_v11 = vpop.f32.mrb[31].mxu1  ;;  %v4028_v15 = vpop.f32.mrb[87].mxu0 }
 0x435   :  { %v3290_v38 = vadd.f32 %v4004_v8, %v3250_v9 }
 0x437   :  { %v3330_v16 = vadd.f32 %v4026_v13, %v3290_v38 }
 0x451   :  { %v4046_v19 = vpop.f32.mrb[32].mxu1  ;;  %v4068_v20 = vpop.f32.mrb[88].mxu0 }
 0x452   :  { %v4047_v21 = vpop.f32.mrb[33].mxu1  ;;  %v4069_v22 = vpop.f32.mrb[89].mxu0 }
 0x453   :  { %v4048_v23 = vadd.f32 %v4047_v21, %v4046_v19  ;;  %v4070_v24 = vadd.f32 %v4069_v22, %v4068_v20  ;;  %v4049_v25 = vpop.f32.mrb[34].mxu1  ;;  %v4071_v17 = vpop.f32.mrb[90].mxu0 }
 0x454   :  { %v4050_v26 = vpop.f32.mrb[35].mxu1  ;;  %v4072_v28 = vpop.f32.mrb[91].mxu0 }
 0x455   :  { %v3370_v14 = vadd.f32 %v4048_v23, %v3330_v16 }
 0x457   :  { %v3410_v30 = vadd.f32 %v4070_v24, %v3370_v14 }
 0x471   :  { %v4090_v31 = vpop.f32.mrb[36].mxu1 }
 0x472   :  { %v4091_v32 = vpop.f32.mrb[37].mxu1 }
 0x473   :  { %v4092_v33 = vadd.f32 %v4091_v32, %v4090_v31  ;;  %v4093_v35 = vpop.f32.mrb[38].mxu1 }
 0x474   :  { %v4094_v37 = vpop.f32.mrb[39].mxu1 }
 0x475   :  { %v3450_v18 = vadd.f32 %v4092_v33, %v3410_v30 }
 0x477   :  { %3455 = vst [vmem:[%s5710_s8] sm:$0xff] %v3450_v18 }

</bundles_post_ra>
